<compile_context>
chip_gen: v5e
topology: v5e:2x2
jax: 0.10.0
libtpu: 0.0.40
codegen_flags: <defaults>
</compile_context>

<pallas_src>
import jax
import jax.numpy as jnp
from jax.experimental import pallas as pl
from jax.experimental.pallas import tpu as pltpu

NIN = 784
H1 = 512
H2 = 256
NOUT = 10
NPAD = 128  # lane-dense output width


def mlp_kernel(x_ref, w1_ref, b1_ref, w2_ref, b2_ref, w3_ref, b3_ref, o_ref):
    # Cast the streamed f32 activation tile to bf16 in-kernel (saves a wrapper
    # HBM round trip); all matmuls accumulate in f32 on the MXU.
    x = x_ref[...].astype(jnp.bfloat16)
    # fc1 + ReLU
    h1 = jnp.dot(x, w1_ref[...], preferred_element_type=jnp.float32)
    h1 = jnp.maximum(h1 + b1_ref[...], 0.0).astype(jnp.bfloat16)
    # dropout1: identity in eval mode
    # fc2 + ReLU
    h2 = jnp.dot(h1, w2_ref[...], preferred_element_type=jnp.float32)
    h2 = jnp.maximum(h2 + b2_ref[...], 0.0).astype(jnp.bfloat16)
    # dropout2: identity in eval mode
    # fc3 (logits into lane-dense 128-wide padded output)
    out = jnp.dot(h2, w3_ref[...], preferred_element_type=jnp.float32)
    o_ref[...] = (out + b3_ref[...]).astype(o_ref.dtype)


def prepare_params(w1, b1, w2, b2, w3, b3):
    """One-time parameter prep: bf16 weights, lane-padded final layer."""
    w1b = w1.astype(jnp.bfloat16)
    w2b = w2.astype(jnp.bfloat16)
    w3p = jnp.pad(w3.astype(jnp.bfloat16), ((0, 0), (0, NPAD - NOUT)))
    b3p = jnp.pad(b3, ((0, 0), (0, NPAD - NOUT)))
    return w1b, b1, w2b, b2, w3p, b3p


def _round_up(a, m):
    return ((a + m - 1) // m) * m


def mlp_forward(x, w1b, b1, w2b, b2, w3p, b3p, *, tb_max=2048):
    """x: [B, ...] float32 (flattened to [B, 784]). Returns [B, 10] f32 logits."""
    B = x.shape[0]
    x = x.reshape(B, -1)
    assert x.shape[1] == NIN

    # Adaptive batch tile: latency-optimal for tiny B, throughput for large B.
    if B <= 16:
        tb = 16
    else:
        tb = min(tb_max, _round_up(B, 128))
        # For larger batches keep >= 2 grid steps so v7x's second TC is used.
        if B >= 256 and pl.cdiv(B, tb) < 2:
            tb = _round_up(pl.cdiv(B, 2), 128)

    n_tiles = pl.cdiv(B, tb)
    Bp = n_tiles * tb
    if Bp != B:
        x = jnp.pad(x, ((0, Bp - B), (0, 0)))

    flops = 2 * Bp * (NIN * H1 + H1 * H2 + H2 * NPAD)
    bytes_accessed = (
        Bp * NIN * 4                                   # streamed f32 x tiles
        + (w1b.size + w2b.size + w3p.size) * 2         # resident bf16 weights
        + (b1.size + b2.size + b3p.size) * 4           # resident f32 biases
        + Bp * NPAD * 4                                 # f32 output
    )

    out_padded = pl.pallas_call(
        mlp_kernel,
        out_shape=jax.ShapeDtypeStruct((Bp, NPAD), jnp.float32),
        grid_spec=pltpu.PrefetchScalarGridSpec(
            num_scalar_prefetch=0,
            grid=(n_tiles,),
            in_specs=[
                # activations: tiled over the batch grid axis (f32, cast in-kernel)
                pl.BlockSpec((tb, NIN), lambda i: (i, 0)),
                # weights/biases: constant block index -> resident across tiles
                pl.BlockSpec((NIN, H1), lambda i: (0, 0)),
                pl.BlockSpec((1, H1), lambda i: (0, 0)),
                pl.BlockSpec((H1, H2), lambda i: (0, 0)),
                pl.BlockSpec((1, H2), lambda i: (0, 0)),
                pl.BlockSpec((H2, NPAD), lambda i: (0, 0)),
                pl.BlockSpec((1, NPAD), lambda i: (0, 0)),
            ],
            out_specs=pl.BlockSpec((tb, NPAD), lambda i: (i, 0)),
        ),
        compiler_params=pltpu.CompilerParams(
            dimension_semantics=("parallel",),
            vmem_limit_bytes=32 << 20,
        ),
        cost_estimate=pl.CostEstimate(
            flops=flops, transcendentals=0, bytes_accessed=bytes_accessed),
    )(x, w1b, b1, w2b, b2, w3p, b3p)

    return out_padded[:B, :NOUT]


def init_params(key):
    """Deterministic init mimicking nn.Linear default (uniform(-1/sqrt(fan_in), +))."""
    def linear(key, fan_in, fan_out):
        kw, kb = jax.random.split(key)
        bound = 1.0 / jnp.sqrt(fan_in)
        # stored as [in, out] so the kernel does x @ W
        w = jax.random.uniform(kw, (fan_in, fan_out), jnp.float32, -bound, bound)
        b = jax.random.uniform(kb, (1, fan_out), jnp.float32, -bound, bound)
        return w, b

    k1, k2, k3 = jax.random.split(key, 3)
    w1, b1 = linear(k1, NIN, H1)
    w2, b2 = linear(k2, H1, H2)
    w3, b3 = linear(k3, H2, NOUT)
    return w1, b1, w2, b2, w3, b3


if __name__ == "__main__":
    key = jax.random.PRNGKey(0)
    kx, kp = jax.random.split(key)

    # Input like MNIST images: [B, 1, 28, 28]; forward flattens to [B, 784].
    B = 8
    x_img = jax.random.normal(kx, (B, 1, 28, 28), jnp.float32)

    w1, b1, w2, b2, w3, b3 = init_params(kp)
    params = prepare_params(w1, b1, w2, b2, w3, b3)  # one-time bf16/pad prep

    fwd = jax.jit(mlp_forward)
    out = jax.block_until_ready(fwd(x_img, *params))

    # Reference in plain JAX following the same bf16-weights / f32-accumulate path.
    x = x_img.reshape(B, -1)
    xb = x.astype(jnp.bfloat16)
    w1b, w2b, w3b = (w.astype(jnp.bfloat16) for w in (w1, w2, w3))
    h1 = jnp.maximum(
        jnp.dot(xb, w1b, preferred_element_type=jnp.float32) + b1, 0.0
    ).astype(jnp.bfloat16)
    h2 = jnp.maximum(
        jnp.dot(h1, w2b, preferred_element_type=jnp.float32) + b2, 0.0
    ).astype(jnp.bfloat16)
    ref = jnp.dot(h2, w3b, preferred_element_type=jnp.float32) + b3

    assert out.shape == (B, NOUT)
    assert jnp.allclose(out, ref, atol=2e-2, rtol=2e-2)

    print("KERNEL_OK")
</pallas_src>

<mosaic_0001>
module attributes {stable_mosaic.version = 11 : i64} {
  func.func @mlp_kernel(%arg0: i32, %arg1: memref<16x784xf32, #tpu.memory_space<vmem>>, %arg2: memref<784x512xbf16, #tpu.memory_space<vmem>>, %arg3: memref<1x512xf32, #tpu.memory_space<vmem>>, %arg4: memref<512x256xbf16, #tpu.memory_space<vmem>>, %arg5: memref<1x256xf32, #tpu.memory_space<vmem>>, %arg6: memref<256x128xbf16, #tpu.memory_space<vmem>>, %arg7: memref<1x128xf32, #tpu.memory_space<vmem>>, %arg8: memref<16x128xf32, #tpu.memory_space<vmem>>) attributes {dimension_semantics = [#tpu.dimension_semantics<parallel>], iteration_bounds = array<i64: 1>, scalar_prefetch = 0 : i64, scratch_operands = 0 : i64, tpu.core_type = #tpu.core_type<tc>, window_params = [{transform_indices = @transform_0, window_bounds = array<i64: 16, 784>}, {pipeline_mode = #tpu.pipeline_mode<synchronous>, transform_indices = @transform_1, window_bounds = array<i64: 784, 512>}, {pipeline_mode = #tpu.pipeline_mode<synchronous>, transform_indices = @transform_2, window_bounds = array<i64: 1, 512>}, {pipeline_mode = #tpu.pipeline_mode<synchronous>, transform_indices = @transform_3, window_bounds = array<i64: 512, 256>}, {pipeline_mode = #tpu.pipeline_mode<synchronous>, transform_indices = @transform_4, window_bounds = array<i64: 1, 256>}, {pipeline_mode = #tpu.pipeline_mode<synchronous>, transform_indices = @transform_5, window_bounds = array<i64: 256, 128>}, {pipeline_mode = #tpu.pipeline_mode<synchronous>, transform_indices = @transform_6, window_bounds = array<i64: 1, 128>}, {transform_indices = @transform_7, window_bounds = array<i64: 16, 128>}]} {
    %c0 = arith.constant 0 : index
    %c0_0 = arith.constant 0 : index
    %0 = vector.load %arg1[%c0, %c0_0] : memref<16x784xf32, #tpu.memory_space<vmem>>, vector<16x784xf32>
    %1 = arith.truncf %0 : vector<16x784xf32> to vector<16x784xbf16>
    %c0_1 = arith.constant 0 : index
    %c0_2 = arith.constant 0 : index
    %2 = vector.load %arg2[%c0_1, %c0_2] : memref<784x512xbf16, #tpu.memory_space<vmem>>, vector<784x512xbf16>
    %cst = arith.constant dense<0.000000e+00> : vector<16x512xf32>
    %3 = tpu.matmul %1, %2, %cst {dimension_numbers = #tpu.dot_dimension_numbers<[1], [0], [0], [1], [0, 0, 1, 1], [], []>} : vector<16x784xbf16>, vector<784x512xbf16>, vector<16x512xf32> -> vector<16x512xf32>
    %c0_3 = arith.constant 0 : index
    %c0_4 = arith.constant 0 : index
    %4 = vector.load %arg3[%c0_3, %c0_4] : memref<1x512xf32, #tpu.memory_space<vmem>>, vector<1x512xf32>
    %5 = vector.broadcast %4 : vector<1x512xf32> to vector<16x512xf32>
    %6 = arith.addf %3, %5 : vector<16x512xf32>
    %cst_5 = arith.constant 0.000000e+00 : f32
    %7 = vector.broadcast %cst_5 : f32 to vector<16x512xf32>
    %8 = arith.maximumf %6, %7 : vector<16x512xf32>
    %9 = arith.truncf %8 : vector<16x512xf32> to vector<16x512xbf16>
    %c0_6 = arith.constant 0 : index
    %c0_7 = arith.constant 0 : index
    %10 = vector.load %arg4[%c0_6, %c0_7] : memref<512x256xbf16, #tpu.memory_space<vmem>>, vector<512x256xbf16>
    %cst_8 = arith.constant dense<0.000000e+00> : vector<16x256xf32>
    %11 = tpu.matmul %9, %10, %cst_8 {dimension_numbers = #tpu.dot_dimension_numbers<[1], [0], [0], [1], [0, 0, 1, 1], [], []>} : vector<16x512xbf16>, vector<512x256xbf16>, vector<16x256xf32> -> vector<16x256xf32>
    %c0_9 = arith.constant 0 : index
    %c0_10 = arith.constant 0 : index
    %12 = vector.load %arg5[%c0_9, %c0_10] : memref<1x256xf32, #tpu.memory_space<vmem>>, vector<1x256xf32>
    %13 = vector.broadcast %12 : vector<1x256xf32> to vector<16x256xf32>
    %14 = arith.addf %11, %13 : vector<16x256xf32>
    %cst_11 = arith.constant 0.000000e+00 : f32
    %15 = vector.broadcast %cst_11 : f32 to vector<16x256xf32>
    %16 = arith.maximumf %14, %15 : vector<16x256xf32>
    %17 = arith.truncf %16 : vector<16x256xf32> to vector<16x256xbf16>
    %c0_12 = arith.constant 0 : index
    %c0_13 = arith.constant 0 : index
    %18 = vector.load %arg6[%c0_12, %c0_13] : memref<256x128xbf16, #tpu.memory_space<vmem>>, vector<256x128xbf16>
    %cst_14 = arith.constant dense<0.000000e+00> : vector<16x128xf32>
    %19 = tpu.matmul %17, %18, %cst_14 {dimension_numbers = #tpu.dot_dimension_numbers<[1], [0], [0], [1], [0, 0, 1, 1], [], []>} : vector<16x256xbf16>, vector<256x128xbf16>, vector<16x128xf32> -> vector<16x128xf32>
    %c0_15 = arith.constant 0 : index
    %c0_16 = arith.constant 0 : index
    %20 = vector.load %arg7[%c0_15, %c0_16] : memref<1x128xf32, #tpu.memory_space<vmem>>, vector<1x128xf32>
    %21 = vector.broadcast %20 : vector<1x128xf32> to vector<16x128xf32>
    %22 = arith.addf %19, %21 : vector<16x128xf32>
    %c0_17 = arith.constant 0 : index
    %c0_18 = arith.constant 0 : index
    %23 = vector.load %arg8[%c0_17, %c0_18] : memref<16x128xf32, #tpu.memory_space<vmem>>, vector<16x128xf32>
    tpu.vector_store %arg8[%c0_17, %c0_18], %22 {strides = array<i32>} : memref<16x128xf32, #tpu.memory_space<vmem>>, vector<16x128xf32>,
    return
  }
  func.func @transform_0(%arg0: i32) -> (i32, i32) {
    %c0_i32 = arith.constant 0 : i32
    %c0_i32_0 = arith.constant 0 : i32
    return %arg0, %c0_i32 : i32, i32
  }
  func.func @transform_1(%arg0: i32) -> (i32, i32) {
    %c0_i32 = arith.constant 0 : i32
    %c0_i32_0 = arith.constant 0 : i32
    %c0_i32_1 = arith.constant 0 : i32
    return %c0_i32, %c0_i32_0 : i32, i32
  }
  func.func @transform_2(%arg0: i32) -> (i32, i32) {
    %c0_i32 = arith.constant 0 : i32
    %c0_i32_0 = arith.constant 0 : i32
    %c0_i32_1 = arith.constant 0 : i32
    return %c0_i32, %c0_i32_0 : i32, i32
  }
  func.func @transform_3(%arg0: i32) -> (i32, i32) {
    %c0_i32 = arith.constant 0 : i32
    %c0_i32_0 = arith.constant 0 : i32
    %c0_i32_1 = arith.constant 0 : i32
    return %c0_i32, %c0_i32_0 : i32, i32
  }
  func.func @transform_4(%arg0: i32) -> (i32, i32) {
    %c0_i32 = arith.constant 0 : i32
    %c0_i32_0 = arith.constant 0 : i32
    %c0_i32_1 = arith.constant 0 : i32
    return %c0_i32, %c0_i32_0 : i32, i32
  }
  func.func @transform_5(%arg0: i32) -> (i32, i32) {
    %c0_i32 = arith.constant 0 : i32
    %c0_i32_0 = arith.constant 0 : i32
    %c0_i32_1 = arith.constant 0 : i32
    return %c0_i32, %c0_i32_0 : i32, i32
  }
  func.func @transform_6(%arg0: i32) -> (i32, i32) {
    %c0_i32 = arith.constant 0 : i32
    %c0_i32_0 = arith.constant 0 : i32
    %c0_i32_1 = arith.constant 0 : i32
    return %c0_i32, %c0_i32_0 : i32, i32
  }
  func.func @transform_7(%arg0: i32) -> (i32, i32) {
    %c0_i32 = arith.constant 0 : i32
    %c0_i32_0 = arith.constant 0 : i32
    return %arg0, %c0_i32 : i32, i32
  }
}

</mosaic_0001>

<bundles_post_ra>
// kernel: mlp_forward.1
= control target key start
LH: loop header
LB: loop body
LE: loop exit
PB: predicated region body
PF: predicated region fallthrough
CT: control target
= control target key end

     0   :  { %12 = vsyncpa [#allocation3], 0  ;;  %s3747_s27 = smov [#allocation2]   ;;  %s3748_s29 = smov 256   ;;  %s4341_s0 = inlined_call_operand.vmem [shape: f32[16,784], index: 0, kind: input, shape index: {}]   ;;  %s4342_s1 = inlined_call_operand.hbm [shape: bf16[784,512], index: 1, kind: input, shape index: {}]   ;;  %s4343_s2 = inlined_call_operand.vmem [shape: f32[1,512], index: 2, kind: input, shape index: {}]   ;;  %s4344_s3 = inlined_call_operand.vmem [shape: bf16[512,256], index: 3, kind: input, shape index: {}]   ;;  %s4345_s4 = inlined_call_operand.vmem [shape: f32[1,256], index: 4, kind: input, shape index: {}]   ;;  %s4346_s5 = inlined_call_operand.vmem [shape: bf16[256,128], index: 5, kind: input, shape index: {}]   ;;  %s4347_s6 = inlined_call_operand.vmem [shape: f32[1,128], index: 6, kind: input, shape index: {}]   ;;  %s4348_s7 = inlined_call_operand.vmem [shape: f32[16,128], index: 7, kind: output, shape index: {}]  }
   0x1   :  { %s19_s26 = sshll.u32 %s4342_s1, 4  ;;  %s21_s28 = sshll.u32 %s3747_s27, 4  ;;  %s20_s26 = int_to_ptr.hbm [resolvable:$true] %s19_s26  ;;  %s22_s28 = int_to_ptr.vmem [resolvable:$true] %s21_s28 }
   0x2   :  { %s3749_s30 = smov 16  }
   0x3   :  { %27 = dma.hbm_to_vmem [thread:$0]  %s20_s26, 25088, %s22_s28, [#allocation3], %s3748_s29, %s3748_s29, %s3749_s30  }
   0x4   :  { %3745 = dma.done.wait [#allocation3], 25088  }
   0x5   :  { %3746 = vsyncadd [#allocation3], 4294942208  ;;  %v2447_v0 = vld [vmem:[#allocation2 + $0xe0] sm:$0xf]  ;;  %v3471_v1 = vld [vmem:[#allocation2 + $0xec] sm:$0xf0] }
   0x6   :  { %v2575_v2 = vld [vmem:[#allocation2 + $0x1e0] sm:$0xf]  ;;  %v2448_v3 = vor.u32 %v3471_v1, %v2447_v0  ;;  %v3503_v4 = vld [vmem:[#allocation2 + $0x1ec] sm:$0xf0]  ;;  %vm1250_vm0 = vcmask 130048  }
   0x7   :  { %v2703_v5 = vld [vmem:[#allocation2 + $0x2e0] sm:$0xf]  ;;  %v3535_v6 = vld [vmem:[#allocation2 + $0x2ec] sm:$0xf0]  ;;  %v2576_v7 = vor.u32 %v3503_v4, %v2575_v2 }
   0x8   :  { %v2704_v8 = vor.u32 %v3535_v6, %v2703_v5  ;;  %v2831_v9 = vld [vmem:[#allocation2 + $0x3e0] sm:$0xf]  ;;  %v3567_v10 = vld [vmem:[#allocation2 + $0x3ec] sm:$0xf0]  ;;  %1254 = vmatpush.bf16.msra.mxu0 %v2448_v3 }
   0x9   :  { %v2431_v11 = vld [vmem:[#allocation2 + $0xc0] sm:$0xf]  ;;  %v2832_v12 = vor.u32 %v3567_v10, %v2831_v9  ;;  %v3467_v13 = vld [vmem:[#allocation2 + $0xcc] sm:$0xf0]  ;;  %1268 = vmatpush.bf16.msra.mxu1 %v2576_v7 }
   0xa   :  { %v2559_v14 = vld [vmem:[#allocation2 + $0x1c0] sm:$0xf]  ;;  %v3499_v15 = vld [vmem:[#allocation2 + $0x1cc] sm:$0xf0]  ;;  %1282 = vmatpush.bf16.msra.mxu2 %v2704_v8  ;;  %v2432_v16 = vor.u32 %v3467_v13, %v2431_v11 }
   0xb   :  { %v2560_v17 = vor.u32 %v3499_v15, %v2559_v14  ;;  %v2687_v18 = vld [vmem:[#allocation2 + $0x2c0] sm:$0xf]  ;;  %v3531_v19 = vld [vmem:[#allocation2 + $0x2cc] sm:$0xf0]  ;;  %1296 = vmatpush.bf16.msra.mxu3 %v2832_v12 }
   0xc   :  { %v2815_v20 = vld [vmem:[#allocation2 + $0x3c0] sm:$0xf]  ;;  %v2688_v21 = vor.u32 %v3531_v19, %v2687_v18  ;;  %v3563_v22 = vld [vmem:[#allocation2 + $0x3cc] sm:$0xf0]  ;;  %1255 = vmatpush.bf16.msra.mxu0 %v2432_v16 }
   0xd   :  { %v2415_v23 = vld [vmem:[#allocation2 + $0xa0] sm:$0xf]  ;;  %v3463_v24 = vld [vmem:[#allocation2 + $0xac] sm:$0xf0]  ;;  %v2816_v25 = vor.u32 %v3563_v22, %v2815_v20  ;;  %1269 = vmatpush.bf16.msra.mxu1 %v2560_v17 }
   0xe   :  { %v2543_v26 = vld [vmem:[#allocation2 + $0x1a0] sm:$0xf]  ;;  %v3495_v27 = vld [vmem:[#allocation2 + $0x1ac] sm:$0xf0]  ;;  %v2416_v29 = vor.u32 %v3463_v24, %v2415_v23  ;;  %1283 = vmatpush.bf16.msra.mxu2 %v2688_v21 }
   0xf   :  { %v2671_v28 = vld [vmem:[#allocation2 + $0x2a0] sm:$0xf]  ;;  %v3527_v30 = vld [vmem:[#allocation2 + $0x2ac] sm:$0xf0]  ;;  %v2544_v33 = vor.u32 %v3495_v27, %v2543_v26  ;;  %1297 = vmatpush.bf16.msra.mxu3 %v2816_v25 }
  0x10   :  { %v2799_v31 = vld [vmem:[#allocation2 + $0x3a0] sm:$0xf]  ;;  %v3559_v32 = vld [vmem:[#allocation2 + $0x3ac] sm:$0xf0]  ;;  %v2672_v34 = vor.u32 %v3527_v30, %v2671_v28  ;;  %1256 = vmatpush.bf16.msra.mxu0 %v2416_v29 }
  0x11   :  { %v2399_v35 = vld [vmem:[#allocation2 + $0x80] sm:$0xf]  ;;  %v3459_v36 = vld [vmem:[#allocation2 + $0x8c] sm:$0xf0]  ;;  %v2800_v38 = vor.u32 %v3559_v32, %v2799_v31  ;;  %1270 = vmatpush.bf16.msra.mxu1 %v2544_v33  ;;  %v3469_v32 = vld [vmem:[#allocation2 + $0xe4] sm:$0xf] }
  0x12   :  { %v2527_v37 = vld [vmem:[#allocation2 + $0x180] sm:$0xf]  ;;  %v3491_v39 = vld [vmem:[#allocation2 + $0x18c] sm:$0xf0]  ;;  %v2400_v44 = vor.u32 %v3459_v36, %v2399_v35  ;;  %1284 = vmatpush.bf16.msra.mxu2 %v2672_v34  ;;  %v2449_v33 = vld [vmem:[#allocation2 + $0xf0] sm:$0xf0] }
  0x13   :  { %v2655_v40 = vld [vmem:[#allocation2 + $0x280] sm:$0xf]  ;;  %v3523_v41 = vld [vmem:[#allocation2 + $0x28c] sm:$0xf0]  ;;  %v2528_v45 = vor.u32 %v3491_v39, %v2527_v37  ;;  %1298 = vmatpush.bf16.msra.mxu3 %v2800_v38  ;;  %v52_v36 = vld [vmem:[%s4341_s0 + $0x48] sm:$0xff] }
  0x14   :  { %v2783_v42 = vld [vmem:[#allocation2 + $0x380] sm:$0xf]  ;;  %v3555_v43 = vld [vmem:[#allocation2 + $0x38c] sm:$0xf0]  ;;  %v2656_v46 = vor.u32 %v3523_v41, %v2655_v40  ;;  %1257 = vmatpush.bf16.msra.mxu0 %v2400_v44  ;;  %v3501_v41 = vld [vmem:[#allocation2 + $0x1e4] sm:$0xf] }
  0x15   :  { %v2383_v47 = vld [vmem:[#allocation2 + $0x60] sm:$0xf]  ;;  %v3455_v48 = vld [vmem:[#allocation2 + $0x6c] sm:$0xf0]  ;;  %v2784_v50 = vor.u32 %v3555_v43, %v2783_v42  ;;  %1271 = vmatpush.bf16.msra.mxu1 %v2528_v45  ;;  %v50_v43 = vld [vmem:[%s4341_s0 + $0x38] sm:$0xff] }
  0x16   :  { %v2511_v49 = vld [vmem:[#allocation2 + $0x160] sm:$0xf]  ;;  %v3487_v51 = vld [vmem:[#allocation2 + $0x16c] sm:$0xf0]  ;;  %v2384_v56 = vor.u32 %v3455_v48, %v2383_v47  ;;  %1285 = vmatpush.bf16.msra.mxu2 %v2656_v46  ;;  %v2577_v46 = vld [vmem:[#allocation2 + $0x1f0] sm:$0xf0] }
  0x17   :  { %v2639_v52 = vld [vmem:[#allocation2 + $0x260] sm:$0xf]  ;;  %v3519_v53 = vld [vmem:[#allocation2 + $0x26c] sm:$0xf0]  ;;  %v2512_v57 = vor.u32 %v3487_v51, %v2511_v49  ;;  %1299 = vmatpush.bf16.msra.mxu3 %v2784_v50  ;;  %v46_v47 = vld [vmem:[%s4341_s0 + $0x18] sm:$0xff]  ;;  %v2452_v50 = vor.u32 %v3469_v32, %v2449_v33 }
  0x18   :  { %v2767_v54 = vld [vmem:[#allocation2 + $0x360] sm:$0xf]  ;;  %v3551_v55 = vld [vmem:[#allocation2 + $0x36c] sm:$0xf0]  ;;  %v2640_v58 = vor.u32 %v3519_v53, %v2639_v52  ;;  %1258 = vmatpush.bf16.msra.mxu0 %v2384_v56 }
  0x19   :  { %v2367_v59 = vld [vmem:[#allocation2 + $0x40] sm:$0xf]  ;;  %v3451_v60 = vld [vmem:[#allocation2 + $0x4c] sm:$0xf0]  ;;  %v2768_v62 = vor.u32 %v3551_v55, %v2767_v54  ;;  %1272 = vmatpush.bf16.msra.mxu1 %v2512_v57  ;;  %v3465_v57 = vld [vmem:[#allocation2 + $0xc4] sm:$0xf] }
  0x1a   :  { %v2495_v61 = vld [vmem:[#allocation2 + $0x140] sm:$0xf]  ;;  %v3483_v63 = vld [vmem:[#allocation2 + $0x14c] sm:$0xf0]  ;;  %v2368_v4 = vor.u32 %v3451_v60, %v2367_v59  ;;  %1286 = vmatpush.bf16.msra.mxu2 %v2640_v58  ;;  %v2433_v58 = vld [vmem:[#allocation2 + $0xd0] sm:$0xf0] }
  0x1b   :  { %v2623_v0 = vld [vmem:[#allocation2 + $0x240] sm:$0xf]  ;;  %v3515_v1 = vld [vmem:[#allocation2 + $0x24c] sm:$0xf0]  ;;  %v2496_v6 = vor.u32 %v3483_v63, %v2495_v61  ;;  %1300 = vmatpush.bf16.msra.mxu3 %v2768_v62  ;;  %v44_v61 = vld [vmem:[%s4341_s0 + $0x8] sm:$0xff]  ;;  %v2580_v63 = vor.u32 %v3501_v41, %v2577_v46 }
  0x1c   :  { %v2751_v2 = vld [vmem:[#allocation2 + $0x340] sm:$0xf]  ;;  %v3547_v3 = vld [vmem:[#allocation2 + $0x34c] sm:$0xf0]  ;;  %v2624_v7 = vor.u32 %v3515_v1, %v2623_v0  ;;  %1259 = vmatpush.bf16.msra.mxu0 %v2368_v4  ;;  %v3497_v1 = vld [vmem:[#allocation2 + $0x1c4] sm:$0xf]  ;;  %v2436_v4 = vor.u32 %v3465_v57, %v2433_v58 }
  0x1d   :  { %v2351_v5 = vld [vmem:[#allocation2 + $0x20] sm:$0xf]  ;;  %v3447_v8 = vld [vmem:[#allocation2 + $0x2c] sm:$0xf0]  ;;  %v2752_v11 = vor.u32 %v3547_v3, %v2751_v2  ;;  %1273 = vmatpush.bf16.msra.mxu1 %v2496_v6  ;;  %v2561_v2 = vld [vmem:[#allocation2 + $0x1d0] sm:$0xf0] }
  0x1e   :  { %v2479_v9 = vld [vmem:[#allocation2 + $0x120] sm:$0xf]  ;;  %v3479_v10 = vld [vmem:[#allocation2 + $0x12c] sm:$0xf0]  ;;  %v2352_v18 = vor.u32 %v3447_v8, %v2351_v5  ;;  %1287 = vmatpush.bf16.msra.mxu2 %v2624_v7  ;;  %v2513_v41 = vld [vmem:[#allocation2 + $0x170] sm:$0xf0] }
  0x1f   :  { %v2607_v12 = vld [vmem:[#allocation2 + $0x220] sm:$0xf]  ;;  %v3511_v13 = vld [vmem:[#allocation2 + $0x22c] sm:$0xf0]  ;;  %v2480_v23 = vor.u32 %v3479_v10, %v2479_v9  ;;  %1301 = vmatpush.bf16.msra.mxu3 %v2752_v11  ;;  %v3461_v10 = vld [vmem:[#allocation2 + $0xa4] sm:$0xf] }
  0x20   :  { %v2735_v14 = vld [vmem:[#allocation2 + $0x320] sm:$0xf]  ;;  %v3543_v15 = vld [vmem:[#allocation2 + $0x32c] sm:$0xf0]  ;;  %v2608_v24 = vor.u32 %v3511_v13, %v2607_v12  ;;  %1260 = vmatpush.bf16.msra.mxu0 %v2352_v18  ;;  %v2417_v11 = vld [vmem:[#allocation2 + $0xb0] sm:$0xf0]  ;;  %v2564_v12 = vor.u32 %v3497_v1, %v2561_v2 }
  0x21   :  { %v2335_v16 = vld [vmem:[#allocation2] sm:$0xf]  ;;  %v3443_v17 = vld [vmem:[#allocation2 + $0xc] sm:$0xf0]  ;;  %v2736_v28 = vor.u32 %v3543_v15, %v2735_v14  ;;  %1274 = vmatpush.bf16.msra.mxu1 %v2480_v23  ;;  %v3493_v14 = vld [vmem:[#allocation2 + $0x1a4] sm:$0xf] }
  0x22   :  { %v2463_v19 = vld [vmem:[#allocation2 + $0x100] sm:$0xf]  ;;  %v3475_v20 = vld [vmem:[#allocation2 + $0x10c] sm:$0xf0]  ;;  %v2336_v35 = vor.u32 %v3443_v17, %v2335_v16  ;;  %1288 = vmatpush.bf16.msra.mxu2 %v2608_v24  ;;  %v2545_v15 = vld [vmem:[#allocation2 + $0x1b0] sm:$0xf0]  ;;  %v2420_v17 = vor.u32 %v3461_v10, %v2417_v11 }
  0x23   :  { %v2591_v21 = vld [vmem:[#allocation2 + $0x200] sm:$0xf]  ;;  %v3507_v22 = vld [vmem:[#allocation2 + $0x20c] sm:$0xf0]  ;;  %v2464_v39 = vor.u32 %v3475_v20, %v2463_v19  ;;  %1302 = vmatpush.bf16.msra.mxu3 %v2736_v28  ;;  %v2401_v23 = vld [vmem:[#allocation2 + $0x90] sm:$0xf0]  ;;  %v2548_v24 = vor.u32 %v3493_v14, %v2545_v15 }
  0x24   :  { %v2719_v25 = vld [vmem:[#allocation2 + $0x300] sm:$0xf]  ;;  %v3539_v26 = vld [vmem:[#allocation2 + $0x30c] sm:$0xf0]  ;;  %v2592_v40 = vor.u32 %v3507_v22, %v2591_v21  ;;  %1261 = vmatpush.bf16.msra.mxu0 %v2336_v35  ;;  %v3457_v22 = vld [vmem:[#allocation2 + $0x84] sm:$0xf] }
  0x25   :  { %v2959_v27 = vld [vmem:[#allocation2 + $0x4e0] sm:$0xf]  ;;  %v3599_v29 = vld [vmem:[#allocation2 + $0x4ec] sm:$0xf0]  ;;  %v2720_v44 = vor.u32 %v3539_v26, %v2719_v25  ;;  %1275 = vmatpush.bf16.msra.mxu1 %v2464_v39  ;;  %v3489_v26 = vld [vmem:[#allocation2 + $0x184] sm:$0xf] }
  0x26   :  { %v3087_v30 = vld [vmem:[#allocation2 + $0x5e0] sm:$0xf]  ;;  %v3631_v31 = vld [vmem:[#allocation2 + $0x5ec] sm:$0xf0]  ;;  %v2960_v45 = vor.u32 %v3599_v29, %v2959_v27  ;;  %1289 = vmatpush.bf16.msra.mxu2 %v2592_v40  ;;  %v2529_v27 = vld [vmem:[#allocation2 + $0x190] sm:$0xf0]  ;;  %v2404_v29 = vor.u32 %v3457_v22, %v2401_v23 }
  0x27   :  { %v45_v34 = vld [vmem:[%s4341_s0 + $0x10] sm:$0xff]  ;;  %v3103_v37 = vld [vmem:[#allocation2 + $0x600] sm:$0xf]  ;;  %v3088_v49 = vor.u32 %v3631_v31, %v3087_v30  ;;  %1303 = vmatpush.bf16.msra.mxu3 %v2720_v44  ;;  %v3485_v40 = vld [vmem:[#allocation2 + $0x164] sm:$0xf] }
  0x28   :  { %v3635_v38 = vld [vmem:[#allocation2 + $0x60c] sm:$0xf0]  ;;  %v43_v42 = vld [vmem:[%s4341_s0] sm:$0xff]  ;;  %v3811_v54 = vpack.c.bf16 %v52_v36, %v45_v34  ;;  %1310 = vmatpush.bf16.msrb.mxu0 %v2960_v45  ;;  %v2385_v35 = vld [vmem:[#allocation2 + $0x70] sm:$0xf0] }
  0x29   :  { %v53_v48 = vld [vmem:[%s4341_s0 + $0x50] sm:$0xff]  ;;  %v2943_v51 = vld [vmem:[#allocation2 + $0x4c0] sm:$0xf]  ;;  %v3813_v55 = vpack.c.bf16 %v50_v43, %v43_v42  ;;  %v3104_v59 = vor.u32 %v3635_v38, %v3103_v37  ;;  %1324 = vmatpush.bf16.msrb.mxu1 %v3088_v49  ;;  %v3453_v34 = vld [vmem:[#allocation2 + $0x64] sm:$0xf]  ;;  %v2532_v38 = vor.u32 %v3489_v26, %v2529_v27 }
  0x2a   :  { %v3595_v52 = vld [vmem:[#allocation2 + $0x4cc] sm:$0xf0]  ;;  %v3071_v53 = vld [vmem:[#allocation2 + $0x5c0] sm:$0xf]  ;;  %v3815_v60 = vpack.c.bf16 %v53_v48, %v46_v47  ;;  %1290 = vmatmul.bf16.vlgmr.msra.gmra.mxu2 %v3811_v54  ;;  %v56_v37 = vld [vmem:[%s4341_s0 + $0x68] sm:$0xff]  ;;  %v2388_v43 = vor.u32 %v3453_v34, %v2385_v35 }
  0x2b   :  { %v3627_v56 = vld [vmem:[#allocation2 + $0x5cc] sm:$0xf0]  ;;  %v51_v62 = vld [vmem:[%s4341_s0 + $0x40] sm:$0xff]  ;;  %v2944_v0 = vor.u32 %v3595_v52, %v2943_v51  ;;  %1352 = vmatpush.bf16.msrb.mxu3 %v2452_v50  ;;  %1262 = vmatmul.bf16.vlgmr.msra.gmra.mxu0 %v3813_v55  ;;  %v2369_v49 = vld [vmem:[#allocation2 + $0x50] sm:$0xf0]  ;;  %v2516_v51 = vor.u32 %v3485_v40, %v2513_v41 }
  0x2c   :  { %v3072_v3 = vor.u32 %v3627_v56, %v3071_v53  ;;  %v2927_v5 = vld [vmem:[#allocation2 + $0x4a0] sm:$0xf]  ;;  %v3591_v6 = vld [vmem:[#allocation2 + $0x4ac] sm:$0xf0]  ;;  %v3825_v8 = vpack.c.bf16 %v51_v62, %v44_v61  ;;  %1345 = vmatpush.bf16.msrb.mxu2 %v3104_v59  ;;  %1304 = vmatmul.bf16.vlgmr.msra.gmra.mxu3 %v3815_v60  ;;  %v3449_v48 = vld [vmem:[#allocation2 + $0x44] sm:$0xf] }
  0x2d   :  { %v3055_v7 = vld [vmem:[#allocation2 + $0x5a0] sm:$0xf]  ;;  %v3623_v9 = vld [vmem:[#allocation2 + $0x5ac] sm:$0xf0]  ;;  %1311 = vmatpush.bf16.msrb.mxu0 %v2944_v0  ;;  %v2928_v13 = vor.u32 %v3591_v6, %v2927_v5  ;;  %v3481_v53 = vld [vmem:[#allocation2 + $0x144] sm:$0xf]  ;;  %v2372_v58 = vor.u32 %v3449_v48, %v2369_v49 }
  0x2e   :  { %1325 = vmatpush.bf16.msrb.mxu1 %v3072_v3  ;;  %v3056_v16 = vor.u32 %v3623_v9, %v3055_v7  ;;  %v2911_v18 = vld [vmem:[#allocation2 + $0x480] sm:$0xf]  ;;  %v3587_v19 = vld [vmem:[#allocation2 + $0x48c] sm:$0xf0]  ;;  %v2497_v56 = vld [vmem:[#allocation2 + $0x150] sm:$0xf0] }
  0x2f   :  { %1353 = vmatpush.bf16.msrb.mxu3 %v2436_v4  ;;  %v3039_v20 = vld [vmem:[#allocation2 + $0x580] sm:$0xf]  ;;  %1276 = vmatmul.bf16.vlgmr.msra.gmra.mxu1 %v3825_v8  ;;  %v3619_v21 = vld [vmem:[#allocation2 + $0x58c] sm:$0xf0]  ;;  %v2912_v25 = vor.u32 %v3587_v19, %v2911_v18  ;;  %v3445_v0 = vld [vmem:[#allocation2 + $0x24] sm:$0xf]  ;;  %v2500_v4 = vor.u32 %v3481_v53, %v2497_v56 }
  0x30   :  { %1366 = vmatpush.bf16.msra.mxu2 %v2580_v63  ;;  %v3040_v28 = vor.u32 %v3619_v21, %v3039_v20  ;;  %v2895_v30 = vld [vmem:[#allocation2 + $0x460] sm:$0xf]  ;;  %v3583_v31 = vld [vmem:[#allocation2 + $0x46c] sm:$0xf0]  ;;  %v2353_v1 = vld [vmem:[#allocation2 + $0x30] sm:$0xf0] }
  0x31   :  { %1312 = vmatpush.bf16.msrb.mxu0 %v2928_v13  ;;  %v3023_v32 = vld [vmem:[#allocation2 + $0x560] sm:$0xf]  ;;  %v3615_v33 = vld [vmem:[#allocation2 + $0x56c] sm:$0xf0]  ;;  %v2896_v39 = vor.u32 %v3583_v31, %v2895_v30  ;;  %v3477_v2 = vld [vmem:[#allocation2 + $0x124] sm:$0xf]  ;;  %v2356_v11 = vor.u32 %v3445_v0, %v2353_v1 }
  0x32   :  { %1326 = vmatpush.bf16.msrb.mxu1 %v3056_v16  ;;  %v49_v36 = vld [vmem:[%s4341_s0 + $0x30] sm:$0xff]  ;;  %v3024_v42 = vor.u32 %v3615_v33, %v3023_v32  ;;  %v2879_v44 = vld [vmem:[#allocation2 + $0x440] sm:$0xf]  ;;  %v3441_v13 = vld [vmem:[#allocation2 + $0x4] sm:$0xf] }
  0x33   :  { %1354 = vmatpush.bf16.msrb.mxu3 %v2420_v17  ;;  %v3579_v45 = vld [vmem:[#allocation2 + $0x44c] sm:$0xf0]  ;;  %v3007_v46 = vld [vmem:[#allocation2 + $0x540] sm:$0xf]  ;;  %v3835_v50 = vpack.c.bf16 %v56_v37, %v49_v36  ;;  %v2481_v3 = vld [vmem:[#allocation2 + $0x130] sm:$0xf0] }
  0x34   :  { %1367 = vmatpush.bf16.msra.mxu2 %v2564_v12  ;;  %v3611_v47 = vld [vmem:[#allocation2 + $0x54c] sm:$0xf0]  ;;  %v2880_v52 = vor.u32 %v3579_v45, %v2879_v44  ;;  %v2863_v59 = vld [vmem:[#allocation2 + $0x420] sm:$0xf]  ;;  %v2337_v14 = vld [vmem:[#allocation2 + $0x10] sm:$0xf0]  ;;  %v2484_v21 = vor.u32 %v3477_v2, %v2481_v3 }
  0x35   :  { %1313 = vmatpush.bf16.msrb.mxu0 %v2912_v25  ;;  %v3008_v57 = vor.u32 %v3611_v47, %v3007_v46  ;;  %v3575_v61 = vld [vmem:[#allocation2 + $0x42c] sm:$0xf0]  ;;  %v2991_v62 = vld [vmem:[#allocation2 + $0x520] sm:$0xf]  ;;  %v3533_v15 = vld [vmem:[#allocation2 + $0x2e4] sm:$0xf]  ;;  %v2340_v27 = vor.u32 %v3441_v13, %v2337_v14 }
  0x36   :  { %1327 = vmatpush.bf16.msrb.mxu1 %v3040_v28  ;;  %v3607_v63 = vld [vmem:[#allocation2 + $0x52c] sm:$0xf0]  ;;  %v2864_v5 = vor.u32 %v3575_v61, %v2863_v59  ;;  %v2847_v6 = vld [vmem:[#allocation2 + $0x400] sm:$0xf]  ;;  %v2705_v16 = vld [vmem:[#allocation2 + $0x2f0] sm:$0xf0] }
  0x37   :  { %1355 = vmatpush.bf16.msrb.mxu3 %v2404_v29  ;;  %v3571_v7 = vld [vmem:[#allocation2 + $0x40c] sm:$0xf0]  ;;  %v2975_v9 = vld [vmem:[#allocation2 + $0x500] sm:$0xf]  ;;  %v2992_v10 = vor.u32 %v3607_v63, %v2991_v62  ;;  %v3565_v17 = vld [vmem:[#allocation2 + $0x3e4] sm:$0xf]  ;;  %v2708_v31 = vor.u32 %v3533_v15, %v2705_v16 }
  0x38   :  { %1368 = vmatpush.bf16.msra.mxu2 %v2548_v24  ;;  %v3603_v12 = vld [vmem:[#allocation2 + $0x50c] sm:$0xf0]  ;;  %v2833_v18 = vld [vmem:[#allocation2 + $0x3f0] sm:$0xf0]  ;;  %v3597_v19 = vld [vmem:[#allocation2 + $0x4e4] sm:$0xf]  ;;  %v2848_v22 = vor.u32 %v3571_v7, %v2847_v6 }
  0x39   :  { %1314 = vmatpush.bf16.msrb.mxu0 %v2896_v39  ;;  %v2961_v20 = vld [vmem:[#allocation2 + $0x4f0] sm:$0xf0]  ;;  %v47_v23 = vld [vmem:[%s4341_s0 + $0x20] sm:$0xff]  ;;  %v54_v24 = vld [vmem:[%s4341_s0 + $0x58] sm:$0xff]  ;;  %v2976_v26 = vor.u32 %v3603_v12, %v2975_v9  ;;  %v2836_v32 = vor.u32 %v3565_v17, %v2833_v18 }
  0x3a   :  { %1328 = vmatpush.bf16.msrb.mxu1 %v3024_v42  ;;  %3117 = vmatmul.msk.bf16.vlgmr.msrb.gmra.mxu2 %vm1250_vm0, %v3835_v50  ;;  %v3473_v25 = vld [vmem:[#allocation2 + $0x104] sm:$0xf]  ;;  %v2465_v28 = vld [vmem:[#allocation2 + $0x110] sm:$0xf0]  ;;  %v48_v29 = vld [vmem:[%s4341_s0 + $0x28] sm:$0xff]  ;;  %v2964_v36 = vor.u32 %v3597_v19, %v2961_v20  ;;  %v3851_v37 = vpack.c.bf16 %v54_v24, %v47_v23 }
  0x3b   :  { %1356 = vmatpush.bf16.msrb.mxu3 %v2388_v43  ;;  %v55_v30 = vld [vmem:[%s4341_s0 + $0x60] sm:$0xff]  ;;  %v3089_v34 = vld [vmem:[#allocation2 + $0x5f0] sm:$0xf0]  ;;  %v2468_v41 = vor.u32 %v3473_v25, %v2465_v28 }
  0x3c   :  { %1369 = vmatpush.bf16.msra.mxu2 %v2532_v38  ;;  %v3629_v33 = vld [vmem:[#allocation2 + $0x5e4] sm:$0xf]  ;;  %v2689_v38 = vld [vmem:[#allocation2 + $0x2d0] sm:$0xf0]  ;;  %v3853_v42 = vpack.c.bf16 %v55_v30, %v48_v29 }
  0x3d   :  { %1315 = vmatpush.bf16.msrb.mxu0 %v2880_v52  ;;  %v3529_v35 = vld [vmem:[#allocation2 + $0x2c4] sm:$0xf]  ;;  %v2817_v40 = vld [vmem:[#allocation2 + $0x3d0] sm:$0xf0]  ;;  %v3092_v45 = vor.u32 %v3629_v33, %v3089_v34 }
  0x3e   :  { %1329 = vmatpush.bf16.msrb.mxu1 %v3008_v57  ;;  %v3561_v39 = vld [vmem:[#allocation2 + $0x3c4] sm:$0xf]  ;;  %v2945_v44 = vld [vmem:[#allocation2 + $0x4d0] sm:$0xf0]  ;;  %v2692_v46 = vor.u32 %v3529_v35, %v2689_v38 }
  0x3f   :  { %1357 = vmatpush.bf16.msrb.mxu3 %v2372_v58  ;;  %v3593_v43 = vld [vmem:[#allocation2 + $0x4c4] sm:$0xf]  ;;  %v2820_v47 = vor.u32 %v3561_v39, %v2817_v40  ;;  %v3073_v49 = vld [vmem:[#allocation2 + $0x5d0] sm:$0xf0] }
  0x40   :  { %1370 = vmatpush.bf16.msra.mxu2 %v2516_v51  ;;  %v3625_v48 = vld [vmem:[#allocation2 + $0x5c4] sm:$0xf]  ;;  %v2948_v52 = vor.u32 %v3593_v43, %v2945_v44  ;;  %v2673_v53 = vld [vmem:[#allocation2 + $0x2b0] sm:$0xf0] }
  0x41   :  { %1316 = vmatpush.bf16.msrb.mxu0 %v2864_v5  ;;  %v3525_v51 = vld [vmem:[#allocation2 + $0x2a4] sm:$0xf]  ;;  %v2801_v57 = vld [vmem:[#allocation2 + $0x3b0] sm:$0xf0]  ;;  %v3076_v61 = vor.u32 %v3625_v48, %v3073_v49 }
  0x42   :  { %1330 = vmatpush.bf16.msrb.mxu1 %v2992_v10  ;;  %v3557_v56 = vld [vmem:[#allocation2 + $0x3a4] sm:$0xf]  ;;  %v2929_v59 = vld [vmem:[#allocation2 + $0x4b0] sm:$0xf0]  ;;  %v2676_v62 = vor.u32 %v3525_v51, %v2673_v53 }
  0x43   :  { %1358 = vmatpush.bf16.msrb.mxu3 %v2356_v11  ;;  %v3589_v58 = vld [vmem:[#allocation2 + $0x4a4] sm:$0xf]  ;;  %v2804_v63 = vor.u32 %v3557_v56, %v2801_v57  ;;  %v3057_v1 = vld [vmem:[#allocation2 + $0x5b0] sm:$0xf0] }
  0x44   :  { %1371 = vmatpush.bf16.msra.mxu2 %v2500_v4  ;;  %v3621_v0 = vld [vmem:[#allocation2 + $0x5a4] sm:$0xf]  ;;  %v2932_v3 = vor.u32 %v3589_v58, %v2929_v59  ;;  %v2657_v4 = vld [vmem:[#allocation2 + $0x290] sm:$0xf0] }
  0x45   :  { %1317 = vmatpush.bf16.msrb.mxu0 %v2848_v22  ;;  %v3521_v2 = vld [vmem:[#allocation2 + $0x284] sm:$0xf]  ;;  %v2785_v6 = vld [vmem:[#allocation2 + $0x390] sm:$0xf0]  ;;  %v3060_v10 = vor.u32 %v3621_v0, %v3057_v1  ;;  %v2455_v0 = vld [vmem:[#allocation2 + $0xe8] sm:$0xf] }
  0x46   :  { %1331 = vmatpush.bf16.msrb.mxu1 %v2976_v26  ;;  %v3553_v5 = vld [vmem:[#allocation2 + $0x384] sm:$0xf]  ;;  %v2913_v9 = vld [vmem:[#allocation2 + $0x490] sm:$0xf0]  ;;  %v2660_v11 = vor.u32 %v3521_v2, %v2657_v4  ;;  %v3472_v1 = vld [vmem:[#allocation2 + $0xf4] sm:$0xf0] }
  0x47   :  { %1359 = vmatpush.bf16.msrb.mxu3 %v2340_v27  ;;  %v3585_v7 = vld [vmem:[#allocation2 + $0x484] sm:$0xf]  ;;  %v2788_v12 = vor.u32 %v3553_v5, %v2785_v6  ;;  %v3041_v14 = vld [vmem:[#allocation2 + $0x590] sm:$0xf0]  ;;  %v2583_v2 = vld [vmem:[#allocation2 + $0x1e8] sm:$0xf] }
  0x48   :  { %1372 = vmatpush.bf16.msra.mxu2 %v2484_v21  ;;  %1318 = vmatmul.bf16.vlgmr.msrb.gmra.mxu0 %v3851_v37  ;;  %v3617_v13 = vld [vmem:[#allocation2 + $0x584] sm:$0xf]  ;;  %v2916_v16 = vor.u32 %v3585_v7, %v2913_v9  ;;  %v2641_v17 = vld [vmem:[#allocation2 + $0x270] sm:$0xf0]  ;;  %v3504_v4 = vld [vmem:[#allocation2 + $0x1f4] sm:$0xf0] }
  0x49   :  { %1380 = vmatpush.bf16.msra.mxu0 %v2708_v31  ;;  %1332 = vmatmul.bf16.vlgmr.msrb.gmra.mxu1 %v3853_v42  ;;  %v3517_v15 = vld [vmem:[#allocation2 + $0x264] sm:$0xf]  ;;  %v2769_v19 = vld [vmem:[#allocation2 + $0x370] sm:$0xf0]  ;;  %v3044_v22 = vor.u32 %v3617_v13, %v3041_v14  ;;  %v2456_v13 = vor.u32 %v3472_v1, %v2455_v0  ;;  %v2839_v14 = vld [vmem:[#allocation2 + $0x3e8] sm:$0xf] }
  0x4a   :  { %1394 = vmatpush.bf16.msra.mxu1 %v2836_v32  ;;  %1360 = vmatmul.bf16.vlgmr.msrb.gmra.mxu3 %v3813_v55  ;;  %v3549_v18 = vld [vmem:[#allocation2 + $0x364] sm:$0xf]  ;;  %v2897_v21 = vld [vmem:[#allocation2 + $0x470] sm:$0xf0]  ;;  %v2644_v23 = vor.u32 %v3517_v15, %v2641_v17  ;;  %v3568_v15 = vld [vmem:[#allocation2 + $0x3f4] sm:$0xf0]  ;;  %v2584_v17 = vor.u32 %v3504_v4, %v2583_v2 }
  0x4b   :  { %1408 = vmatpush.bf16.msra.mxu3 %v2964_v36  ;;  %v3581_v20 = vld [vmem:[#allocation2 + $0x464] sm:$0xf]  ;;  %v2772_v24 = vor.u32 %v3549_v18, %v2769_v19  ;;  %v3025_v26 = vld [vmem:[#allocation2 + $0x570] sm:$0xf0]  ;;  %v3468_v18 = vld [vmem:[#allocation2 + $0xd4] sm:$0xf0] }
  0x4c   :  { %1373 = vmatpush.bf16.msra.mxu2 %v2468_v41  ;;  %v3613_v25 = vld [vmem:[#allocation2 + $0x564] sm:$0xf]  ;;  %v2900_v28 = vor.u32 %v3581_v20, %v2897_v21  ;;  %v2625_v29 = vld [vmem:[#allocation2 + $0x250] sm:$0xf0]  ;;  %v2711_v20 = vld [vmem:[#allocation2 + $0x2e8] sm:$0xf] }
  0x4d   :  { %1381 = vmatpush.bf16.msra.mxu0 %v2692_v46  ;;  %v3513_v27 = vld [vmem:[#allocation2 + $0x244] sm:$0xf]  ;;  %v2753_v31 = vld [vmem:[#allocation2 + $0x350] sm:$0xf0]  ;;  %v3028_v34 = vor.u32 %v3613_v25, %v3025_v26  ;;  %v3536_v21 = vld [vmem:[#allocation2 + $0x2f4] sm:$0xf0]  ;;  %v2840_v25 = vor.u32 %v3568_v15, %v2839_v14 }
  0x4e   :  { %1395 = vmatpush.bf16.msra.mxu1 %v2820_v47  ;;  %v3545_v30 = vld [vmem:[#allocation2 + $0x344] sm:$0xf]  ;;  %v2881_v33 = vld [vmem:[#allocation2 + $0x450] sm:$0xf0]  ;;  %v2628_v35 = vor.u32 %v3513_v27, %v2625_v29  ;;  %v2823_v27 = vld [vmem:[#allocation2 + $0x3c8] sm:$0xf] }
  0x4f   :  { %1409 = vmatpush.bf16.msra.mxu3 %v2948_v52  ;;  %1374 = vmatmul.bf16.vlgmr.msra.gmra.mxu2 %v3825_v8  ;;  %v3577_v32 = vld [vmem:[#allocation2 + $0x444] sm:$0xf]  ;;  %v2756_v36 = vor.u32 %v3545_v30, %v2753_v31  ;;  %v3009_v39 = vld [vmem:[#allocation2 + $0x550] sm:$0xf0]  ;;  %v2423_v29 = vld [vmem:[#allocation2 + $0xa8] sm:$0xf]  ;;  %v2712_v30 = vor.u32 %v3536_v21, %v2711_v20 }
  0x50   :  { %1422 = vmatpush.bf16.msrb.mxu2 %v3092_v45  ;;  %v3609_v38 = vld [vmem:[#allocation2 + $0x544] sm:$0xf]  ;;  %v2884_v41 = vor.u32 %v3577_v32, %v2881_v33  ;;  %v2609_v43 = vld [vmem:[#allocation2 + $0x230] sm:$0xf0]  ;;  %v3464_v32 = vld [vmem:[#allocation2 + $0xb4] sm:$0xf0] }
  0x51   :  { %1382 = vmatpush.bf16.msra.mxu0 %v2676_v62  ;;  %v3509_v40 = vld [vmem:[#allocation2 + $0x224] sm:$0xf]  ;;  %v2737_v45 = vld [vmem:[#allocation2 + $0x330] sm:$0xf0]  ;;  %v3012_v48 = vor.u32 %v3609_v38, %v3009_v39  ;;  %v2695_v33 = vld [vmem:[#allocation2 + $0x2c8] sm:$0xf] }
  0x52   :  { %1396 = vmatpush.bf16.msra.mxu1 %v2804_v63  ;;  %v3541_v44 = vld [vmem:[#allocation2 + $0x324] sm:$0xf]  ;;  %v2865_v47 = vld [vmem:[#allocation2 + $0x430] sm:$0xf0]  ;;  %v2612_v52 = vor.u32 %v3509_v40, %v2609_v43  ;;  %v2807_v39 = vld [vmem:[#allocation2 + $0x3a8] sm:$0xf]  ;;  %v2424_v40 = vor.u32 %v3464_v32, %v2423_v29 }
  0x53   :  { %1410 = vmatpush.bf16.msra.mxu3 %v2932_v3  ;;  %v3573_v46 = vld [vmem:[#allocation2 + $0x424] sm:$0xf]  ;;  %v2993_v51 = vld [vmem:[#allocation2 + $0x530] sm:$0xf0]  ;;  %v2740_v53 = vor.u32 %v3541_v44, %v2737_v45  ;;  %v2407_v43 = vld [vmem:[#allocation2 + $0x88] sm:$0xf] }
  0x54   :  { %1423 = vmatpush.bf16.msrb.mxu2 %v3076_v61  ;;  %v3605_v49 = vld [vmem:[#allocation2 + $0x524] sm:$0xf]  ;;  %v2593_v57 = vld [vmem:[#allocation2 + $0x210] sm:$0xf0]  ;;  %v2868_v59 = vor.u32 %v3573_v46, %v2865_v47  ;;  %v3460_v46 = vld [vmem:[#allocation2 + $0x94] sm:$0xf0] }
  0x55   :  { %1383 = vmatpush.bf16.msra.mxu0 %v2660_v11  ;;  %v3505_v56 = vld [vmem:[#allocation2 + $0x204] sm:$0xf]  ;;  %v2721_v61 = vld [vmem:[#allocation2 + $0x310] sm:$0xf0]  ;;  %v2996_v3 = vor.u32 %v3605_v49, %v2993_v51  ;;  %v2679_v47 = vld [vmem:[#allocation2 + $0x2a8] sm:$0xf] }
  0x56   :  { %1397 = vmatpush.bf16.msra.mxu1 %v2788_v12  ;;  %v3537_v58 = vld [vmem:[#allocation2 + $0x304] sm:$0xf]  ;;  %v2849_v63 = vld [vmem:[#allocation2 + $0x410] sm:$0xf0]  ;;  %v2596_v7 = vor.u32 %v3505_v56, %v2593_v57  ;;  %v2535_v49 = vld [vmem:[#allocation2 + $0x188] sm:$0xf] }
  0x57   :  { %1411 = vmatpush.bf16.msra.mxu3 %v2916_v16  ;;  %v3569_v62 = vld [vmem:[#allocation2 + $0x404] sm:$0xf]  ;;  %v3105_v6 = vld [vmem:[#allocation2 + $0x610] sm:$0xf0]  ;;  %v2724_v9 = vor.u32 %v3537_v58, %v2721_v61  ;;  %v2439_v16 = vld [vmem:[#allocation2 + $0xc8] sm:$0xf] }
  0x58   :  { %1424 = vmatpush.bf16.msrb.mxu2 %v3060_v10  ;;  %v3633_v5 = vld [vmem:[#allocation2 + $0x604] sm:$0xf]  ;;  %v2977_v11 = vld [vmem:[#allocation2 + $0x510] sm:$0xf0]  ;;  %v2852_v12 = vor.u32 %v3569_v62, %v2849_v63  ;;  %v2440_v26 = vor.u32 %v3468_v18, %v2439_v16  ;;  %v3492_v51 = vld [vmem:[#allocation2 + $0x194] sm:$0xf0] }
  0x59   :  { %1384 = vmatpush.bf16.msra.mxu0 %v2644_v23  ;;  %v3601_v10 = vld [vmem:[#allocation2 + $0x504] sm:$0xf]  ;;  %v3108_v19 = vor.u32 %v3633_v5, %v3105_v6  ;;  %v2567_v23 = vld [vmem:[#allocation2 + $0x1c8] sm:$0xf]  ;;  %v3556_v57 = vld [vmem:[#allocation2 + $0x394] sm:$0xf0]  ;;  %v2536_v61 = vor.u32 %v3492_v51, %v2535_v49 }
  0x5a   :  { %1398 = vmatpush.bf16.msra.mxu1 %v2772_v24  ;;  %v3500_v24 = vld [vmem:[#allocation2 + $0x1d4] sm:$0xf0]  ;;  %v2791_v56 = vld [vmem:[#allocation2 + $0x388] sm:$0xf] }
  0x5b   :  { %1412 = vmatpush.bf16.msra.mxu3 %v2900_v28  ;;  %v3564_v28 = vld [vmem:[#allocation2 + $0x3d4] sm:$0xf0]  ;;  %v2568_v31 = vor.u32 %v3500_v24, %v2567_v23  ;;  %v2391_v58 = vld [vmem:[#allocation2 + $0x68] sm:$0xf] }
  0x5c   :  { %1425 = vmatpush.bf16.msrb.mxu2 %v3044_v22  ;;  %v2980_v22 = vor.u32 %v3601_v10, %v2977_v11  ;;  %v2824_v38 = vor.u32 %v3564_v28, %v2823_v27  ;;  %v3456_v62 = vld [vmem:[#allocation2 + $0x74] sm:$0xf0]  ;;  %v2663_v63 = vld [vmem:[#allocation2 + $0x288] sm:$0xf] }
  0x5d   :  { %1385 = vmatpush.bf16.msra.mxu0 %v2628_v35  ;;  %v2551_v35 = vld [vmem:[#allocation2 + $0x1a8] sm:$0xf]  ;;  %v3524_v0 = vld [vmem:[#allocation2 + $0x294] sm:$0xf0]  ;;  %v2392_v4 = vor.u32 %v3456_v62, %v2391_v58 }
  0x5e   :  { %1399 = vmatpush.bf16.msra.mxu1 %v2756_v36  ;;  %v3496_v36 = vld [vmem:[#allocation2 + $0x1b4] sm:$0xf0]  ;;  %v2519_v1 = vld [vmem:[#allocation2 + $0x168] sm:$0xf] }
  0x5f   :  { %1413 = vmatpush.bf16.msra.mxu3 %v2884_v41  ;;  %v3560_v41 = vld [vmem:[#allocation2 + $0x3b4] sm:$0xf0]  ;;  %v2552_v45 = vor.u32 %v3496_v36, %v2551_v35  ;;  %v2775_v5 = vld [vmem:[#allocation2 + $0x368] sm:$0xf] }
  0x60   :  { %1426 = vmatpush.bf16.msrb.mxu2 %v3028_v34  ;;  %v3532_v34 = vld [vmem:[#allocation2 + $0x2d4] sm:$0xf0]  ;;  %v2503_v14 = vld [vmem:[#allocation2 + $0x148] sm:$0xf] }
  0x61   :  { %1386 = vmatpush.bf16.msra.mxu0 %v2612_v52  ;;  %v2696_v44 = vor.u32 %v3532_v34, %v2695_v33  ;;  %v2808_v52 = vor.u32 %v3560_v41, %v2807_v39  ;;  %v3488_v2 = vld [vmem:[#allocation2 + $0x174] sm:$0xf0]  ;;  %v2759_v18 = vld [vmem:[#allocation2 + $0x348] sm:$0xf] }
  0x62   :  { %1400 = vmatpush.bf16.msra.mxu1 %v2740_v53  ;;  %v2408_v53 = vor.u32 %v3460_v46, %v2407_v43  ;;  %v3552_v6 = vld [vmem:[#allocation2 + $0x374] sm:$0xf0]  ;;  %v2520_v10 = vor.u32 %v3488_v2, %v2519_v1  ;;  %v2359_v20 = vld [vmem:[#allocation2 + $0x28] sm:$0xf] }
  0x63   :  { %1414 = vmatpush.bf16.msra.mxu3 %v2868_v59  ;;  %v3452_v11 = vld [vmem:[#allocation2 + $0x54] sm:$0xf0]  ;;  %v2776_v16 = vor.u32 %v3552_v6, %v2775_v5  ;;  %v2631_v24 = vld [vmem:[#allocation2 + $0x248] sm:$0xf] }
  0x64   :  { %1427 = vmatpush.bf16.msrb.mxu2 %v3012_v48  ;;  %v3528_v48 = vld [vmem:[#allocation2 + $0x2b4] sm:$0xf0]  ;;  %v2743_v29 = vld [vmem:[#allocation2 + $0x328] sm:$0xf] }
  0x65   :  { %1387 = vmatpush.bf16.msra.mxu0 %v2596_v7  ;;  %v2680_v59 = vor.u32 %v3528_v48, %v2679_v47  ;;  %v2375_v7 = vld [vmem:[#allocation2 + $0x48] sm:$0xf]  ;;  %v3484_v15 = vld [vmem:[#allocation2 + $0x154] sm:$0xf0] }
  0x66   :  { %1401 = vmatpush.bf16.msra.mxu1 %v2724_v9  ;;  %v2664_v9 = vor.u32 %v3524_v0, %v2663_v63  ;;  %v3448_v23 = vld [vmem:[#allocation2 + $0x34] sm:$0xf0]  ;;  %v2343_v32 = vld [vmem:[#allocation2 + $0x8] sm:$0xf] }
  0x67   :  { %1415 = vmatpush.bf16.msra.mxu3 %v2852_v12  ;;  %v2647_v12 = vld [vmem:[#allocation2 + $0x268] sm:$0xf]  ;;  %v3480_v27 = vld [vmem:[#allocation2 + $0x134] sm:$0xf0] }
  0x68   :  { %1428 = vmatpush.bf16.msrb.mxu2 %v2996_v3  ;;  %1388 = vmatmul.bf16.vlgmr.msra.gmra.mxu0 %v3811_v54  ;;  %v2792_v3 = vor.u32 %v3556_v57, %v2791_v56  ;;  %v3444_v33 = vld [vmem:[#allocation2 + $0x14] sm:$0xf0]  ;;  %v2471_v36 = vld [vmem:[#allocation2 + $0x108] sm:$0xf]  ;;  %v2457_v57 = vld [vmem:[#allocation2 + $0xf8] sm:$0xf0] }
  0x69   :  { %1443 = vmatpush.bf16.msrb.mxu0 %v3108_v19  ;;  %1402 = vmatmul.bf16.vlgmr.msra.gmra.mxu1 %v3815_v60  ;;  %v3548_v19 = vld [vmem:[#allocation2 + $0x354] sm:$0xf0]  ;;  %v2967_v41 = vld [vmem:[#allocation2 + $0x4e8] sm:$0xf]  ;;  %v2344_v47 = vor.u32 %v3444_v33, %v2343_v32  ;;  %v3458_v33 = vld [vmem:[#allocation2 + $0x8c] sm:$0xf] }
  0x6a   :  { %1450 = vmatpush.bf16.msrb.mxu1 %v2456_v13  ;;  %1416 = vmatmul.bf16.vlgmr.msra.gmra.mxu3 %v3851_v37  ;;  %v3520_v13 = vld [vmem:[#allocation2 + $0x274] sm:$0xf0]  ;;  %v2760_v28 = vor.u32 %v3548_v19, %v2759_v18  ;;  %v2727_v48 = vld [vmem:[#allocation2 + $0x308] sm:$0xf] }
  0x6b   :  { %1464 = vmatpush.bf16.msrb.mxu3 %v2584_v17  ;;  %v2376_v17 = vor.u32 %v3452_v11, %v2375_v7  ;;  %v2648_v21 = vor.u32 %v3520_v13, %v2647_v12  ;;  %v3512_v39 = vld [vmem:[#allocation2 + $0x234] sm:$0xf0]  ;;  %v2951_v58 = vld [vmem:[#allocation2 + $0x4c8] sm:$0xf] }
  0x6c   :  { %1429 = vmatpush.bf16.msrb.mxu2 %v2980_v22  ;;  %v2504_v22 = vor.u32 %v3484_v15, %v2503_v14  ;;  %v3600_v43 = vld [vmem:[#allocation2 + $0x4f4] sm:$0xf0]  ;;  %v3079_v62 = vld [vmem:[#allocation2 + $0x5c8] sm:$0xf]  ;;  %v3502_v15 = vld [vmem:[#allocation2 + $0x1ec] sm:$0xf] }
  0x6d   :  { %1478 = vmatpush.bf16.msra.mxu0 %v2712_v30  ;;  %v2360_v30 = vor.u32 %v3448_v23, %v2359_v20  ;;  %v3632_v46 = vld [vmem:[#allocation2 + $0x5f4] sm:$0xf0]  ;;  %v2968_v56 = vor.u32 %v3600_v43, %v2967_v41  ;;  %v2599_v63 = vld [vmem:[#allocation2 + $0x208] sm:$0xf]  ;;  %v2553_v41 = vld [vmem:[#allocation2 + $0x1b8] sm:$0xf0] }
  0x6e   :  { %1451 = vmatpush.bf16.msrb.mxu1 %v2440_v26  ;;  %v2487_v26 = vld [vmem:[#allocation2 + $0x128] sm:$0xf]  ;;  %v3540_v49 = vld [vmem:[#allocation2 + $0x314] sm:$0xf0] }
  0x6f   :  { %1465 = vmatpush.bf16.msrb.mxu3 %v2568_v31  ;;  %1430 = vmatmul.bf16.vlgmr.msrb.gmra.mxu2 %v3853_v42  ;;  %v3544_v31 = vld [vmem:[#allocation2 + $0x334] sm:$0xf0]  ;;  %v2488_v35 = vor.u32 %v3480_v27, %v2487_v26  ;;  %v2728_v1 = vor.u32 %v3540_v49, %v2727_v48  ;;  %v2935_v11 = vld [vmem:[#allocation2 + $0x4a8] sm:$0xf]  ;;  %v3498_v27 = vld [vmem:[#allocation2 + $0x1cc] sm:$0xf] }
  0x70   :  { %1492 = vmatpush.bf16.msra.mxu2 %v2840_v25  ;;  %v3516_v25 = vld [vmem:[#allocation2 + $0x254] sm:$0xf0]  ;;  %v3031_v43 = vld [vmem:[#allocation2 + $0x568] sm:$0xf]  ;;  %v2393_v48 = vld [vmem:[#allocation2 + $0x78] sm:$0xf0] }
  0x71   :  { %1479 = vmatpush.bf16.msra.mxu0 %v2696_v44  ;;  %v2632_v34 = vor.u32 %v3516_v25, %v2631_v24  ;;  %v2744_v44 = vor.u32 %v3544_v31, %v2743_v29  ;;  %v3508_v0 = vld [vmem:[#allocation2 + $0x214] sm:$0xf0]  ;;  %v2919_v24 = vld [vmem:[#allocation2 + $0x488] sm:$0xf] }
  0x72   :  { %1452 = vmatpush.bf16.msrb.mxu1 %v2424_v40  ;;  %v3476_v40 = vld [vmem:[#allocation2 + $0x114] sm:$0xf0]  ;;  %v2600_v7 = vor.u32 %v3508_v0, %v2599_v63  ;;  %v3047_v29 = vld [vmem:[#allocation2 + $0x588] sm:$0xf]  ;;  %v3450_v63 = vld [vmem:[#allocation2 + $0x4c] sm:$0xf] }
  0x73   :  { %1466 = vmatpush.bf16.msrb.mxu3 %v2552_v45  ;;  %v3095_v45 = vld [vmem:[#allocation2 + $0x5e8] sm:$0xf]  ;;  %v3628_v2 = vld [vmem:[#allocation2 + $0x5d4] sm:$0xf0]  ;;  %v2377_v0 = vld [vmem:[#allocation2 + $0x58] sm:$0xf0] }
  0x74   :  { %1493 = vmatpush.bf16.msra.mxu2 %v2824_v38  ;;  %v2615_v38 = vld [vmem:[#allocation2 + $0x228] sm:$0xf]  ;;  %v3080_v12 = vor.u32 %v3628_v2, %v3079_v62  ;;  %v3592_v13 = vld [vmem:[#allocation2 + $0x4b4] sm:$0xf0] }
  0x75   :  { %1480 = vmatpush.bf16.msra.mxu0 %v2680_v59  ;;  %v2616_v51 = vor.u32 %v3512_v39, %v2615_v38  ;;  %v3596_v59 = vld [vmem:[#allocation2 + $0x4d4] sm:$0xf0]  ;;  %v2936_v20 = vor.u32 %v3592_v13, %v2935_v11  ;;  %v2871_v2 = vld [vmem:[#allocation2 + $0x428] sm:$0xf]  ;;  %v3446_v11 = vld [vmem:[#allocation2 + $0x2c] sm:$0xf] }
  0x76   :  { %1453 = vmatpush.bf16.msrb.mxu1 %v2408_v53  ;;  %v2472_v53 = vor.u32 %v3476_v40, %v2471_v36  ;;  %v2952_v6 = vor.u32 %v3596_v59, %v2951_v58  ;;  %v3624_v18 = vld [vmem:[#allocation2 + $0x5b4] sm:$0xf0]  ;;  %v2903_v36 = vld [vmem:[#allocation2 + $0x468] sm:$0xf]  ;;  %v3494_v40 = vld [vmem:[#allocation2 + $0x1ac] sm:$0xf] }
  0x77   :  { %1467 = vmatpush.bf16.msrb.mxu3 %v2536_v61  ;;  %v3096_v61 = vor.u32 %v3632_v46, %v3095_v45  ;;  %v3588_v26 = vld [vmem:[#allocation2 + $0x494] sm:$0xf0]  ;;  %v2556_v49 = vor.u32 %v3494_v40, %v2553_v41  ;;  %v3015_v58 = vld [vmem:[#allocation2 + $0x548] sm:$0xf]  ;;  %v2361_v13 = vld [vmem:[#allocation2 + $0x38] sm:$0xf0] }
  0x78   :  { %1494 = vmatpush.bf16.msra.mxu2 %v2808_v52  ;;  %3118 = vmatmul.msk.bf16.vlgmr.msrb.gmra.mxu0 %vm1250_vm0, %v3835_v50  ;;  %v3470_v52 = vld [vmem:[#allocation2 + $0xec] sm:$0xf]  ;;  %v2920_v32 = vor.u32 %v3588_v26, %v2919_v24  ;;  %v3584_v39 = vld [vmem:[#allocation2 + $0x474] sm:$0xf0]  ;;  %v2364_v24 = vor.u32 %v3446_v11, %v2361_v13  ;;  %v2841_v26 = vld [vmem:[#allocation2 + $0x3f8] sm:$0xf0] }
  0x79   :  { %1481 = vmatpush.bf16.msra.mxu0 %v2664_v9  ;;  %v2460_v5 = vor.u32 %v3470_v52, %v2457_v57  ;;  %v3466_v9 = vld [vmem:[#allocation2 + $0xcc] sm:$0xf]  ;;  %v2904_v46 = vor.u32 %v3584_v39, %v2903_v36  ;;  %v2537_v57 = vld [vmem:[#allocation2 + $0x198] sm:$0xf0]  ;;  %v3612_v59 = vld [vmem:[#allocation2 + $0x554] sm:$0xf0] }
  0x7a   :  { %1454 = vmatpush.bf16.msrb.mxu1 %v2392_v4  ;;  %v3636_v4 = vld [vmem:[#allocation2 + $0x614] sm:$0xf0]  ;;  %v3478_v39 = vld [vmem:[#allocation2 + $0x12c] sm:$0xf]  ;;  %v2489_v40 = vld [vmem:[#allocation2 + $0x138] sm:$0xf0] }
  0x7b   :  { %1468 = vmatpush.bf16.msrb.mxu3 %v2520_v10  ;;  %v2441_v10 = vld [vmem:[#allocation2 + $0xd8] sm:$0xf0]  ;;  %v3626_v11 = vld [vmem:[#allocation2 + $0x5cc] sm:$0xf] }
  0x7c   :  { %1495 = vmatpush.bf16.msra.mxu2 %v2792_v3  ;;  %v3111_v3 = vld [vmem:[#allocation2 + $0x608] sm:$0xf]  ;;  %v2444_v19 = vor.u32 %v3466_v9, %v2441_v10  ;;  %v3608_v9 = vld [vmem:[#allocation2 + $0x534] sm:$0xf0]  ;;  %v2380_v10 = vor.u32 %v3450_v63, %v2377_v0 }
  0x7d   :  { %1482 = vmatpush.bf16.msra.mxu0 %v2648_v21  ;;  %v3112_v14 = vor.u32 %v3636_v4, %v3111_v3  ;;  %v3462_v21 = vld [vmem:[#allocation2 + $0xac] sm:$0xf]  ;;  %v3016_v3 = vor.u32 %v3612_v59, %v3015_v58  ;;  %v3576_v4 = vld [vmem:[#allocation2 + $0x434] sm:$0xf0]  ;;  %v2473_v58 = vld [vmem:[#allocation2 + $0x118] sm:$0xf0] }
  0x7e   :  { %1455 = vmatpush.bf16.msrb.mxu1 %v2376_v17  ;;  %v3063_v17 = vld [vmem:[#allocation2 + $0x5a8] sm:$0xf]  ;;  %v2809_v59 = vld [vmem:[#allocation2 + $0x3b8] sm:$0xf0] }
  0x7f   :  { %1469 = vmatpush.bf16.msrb.mxu3 %v2504_v22  ;;  %v2425_v22 = vld [vmem:[#allocation2 + $0xb8] sm:$0xf0]  ;;  %v3064_v25 = vor.u32 %v3624_v18, %v3063_v17  ;;  %v2983_v18 = vld [vmem:[#allocation2 + $0x508] sm:$0xf] }
  0x80   :  { %1496 = vmatpush.bf16.msra.mxu2 %v2776_v16  ;;  %v2585_v16 = vld [vmem:[#allocation2 + $0x1f8] sm:$0xf0]  ;;  %v2428_v31 = vor.u32 %v3462_v21, %v2425_v22  ;;  %v3604_v21 = vld [vmem:[#allocation2 + $0x514] sm:$0xf0]  ;;  %v3534_v22 = vld [vmem:[#allocation2 + $0x2ec] sm:$0xf] }
  0x81   :  { %1483 = vmatpush.bf16.msra.mxu0 %v2632_v34  ;;  %v2588_v23 = vor.u32 %v3502_v15, %v2585_v16  ;;  %v2409_v34 = vld [vmem:[#allocation2 + $0x98] sm:$0xf0]  ;;  %v2855_v15 = vld [vmem:[#allocation2 + $0x408] sm:$0xf]  ;;  %v3572_v16 = vld [vmem:[#allocation2 + $0x414] sm:$0xf0] }
  0x82   :  { %1456 = vmatpush.bf16.msrb.mxu1 %v2360_v30  ;;  %v3620_v30 = vld [vmem:[#allocation2 + $0x594] sm:$0xf0]  ;;  %v2412_v45 = vor.u32 %v3458_v33, %v2409_v34  ;;  %v3598_v33 = vld [vmem:[#allocation2 + $0x4ec] sm:$0xf]  ;;  %v2969_v34 = vld [vmem:[#allocation2 + $0x4f8] sm:$0xf0] }
  0x83   :  { %1470 = vmatpush.bf16.msrb.mxu3 %v2488_v35  ;;  %v3048_v38 = vor.u32 %v3620_v30, %v3047_v29  ;;  %v2345_v29 = vld [vmem:[#allocation2 + $0x18] sm:$0xf0] }
  0x84   :  { %1497 = vmatpush.bf16.msra.mxu2 %v2760_v28  ;;  %v2569_v28 = vld [vmem:[#allocation2 + $0x1d8] sm:$0xf0] }
  0x85   :  { %1484 = vmatpush.bf16.msra.mxu0 %v2616_v51  ;;  %v2572_v35 = vor.u32 %v3498_v27, %v2569_v28  ;;  %v2887_v51 = vld [vmem:[#allocation2 + $0x448] sm:$0xf]  ;;  %v2856_v27 = vor.u32 %v3572_v16, %v2855_v15  ;;  %v3442_v28 = vld [vmem:[#allocation2 + $0xc] sm:$0xf]  ;;  %v2921_v16 = vld [vmem:[#allocation2 + $0x498] sm:$0xf0] }
  0x86   :  { %1457 = vmatpush.bf16.msrb.mxu1 %v2344_v47  ;;  %v3454_v47 = vld [vmem:[#allocation2 + $0x6c] sm:$0xf]  ;;  %v2348_v41 = vor.u32 %v3442_v28, %v2345_v29 }
  0x87   :  { %1471 = vmatpush.bf16.msrb.mxu3 %v2472_v53  ;;  %v3580_v53 = vld [vmem:[#allocation2 + $0x454] sm:$0xf0]  ;;  %v3586_v15 = vld [vmem:[#allocation2 + $0x48c] sm:$0xf] }
  0x88   :  { %1498 = vmatpush.bf16.msra.mxu2 %v2744_v44  ;;  %v3616_v44 = vld [vmem:[#allocation2 + $0x574] sm:$0xf0]  ;;  %v2888_v62 = vor.u32 %v3580_v53, %v2887_v51  ;;  %v3526_v51 = vld [vmem:[#allocation2 + $0x2ac] sm:$0xf] }
  0x89   :  { %1458 = vmatmul.bf16.vlgmr.msrb.gmra.mxu1 %v3813_v55  ;;  %1485 = vmatpush.bf16.msra.mxu0 %v2600_v7  ;;  %v3032_v52 = vor.u32 %v3616_v44, %v3031_v43  ;;  %v2999_v7 = vld [vmem:[#allocation2 + $0x528] sm:$0xf]  ;;  %v3562_v43 = vld [vmem:[#allocation2 + $0x3cc] sm:$0xf]  ;;  %v2825_v44 = vld [vmem:[#allocation2 + $0x3d8] sm:$0xf0] }
  0x8a   :  { %1506 = vmatpush.bf16.msra.mxu1 %v2968_v56  ;;  %1472 = vmatmul.bf16.vlgmr.msrb.gmra.mxu3 %v3825_v8  ;;  %v3490_v56 = vld [vmem:[#allocation2 + $0x18c] sm:$0xf]  ;;  %v3000_v17 = vor.u32 %v3608_v9, %v2999_v7  ;;  %v2828_v53 = vor.u32 %v3562_v43, %v2825_v44  ;;  %v2665_v7 = vld [vmem:[#allocation2 + $0x298] sm:$0xf0] }
  0x8b   :  { %1520 = vmatpush.bf16.msra.mxu3 %v3096_v61  ;;  %v2396_v61 = vor.u32 %v3454_v47, %v2393_v48  ;;  %v2492_v48 = vor.u32 %v3478_v39, %v2489_v40  ;;  %v3554_v9 = vld [vmem:[#allocation2 + $0x38c] sm:$0xf]  ;;  %v2617_v44 = vld [vmem:[#allocation2 + $0x238] sm:$0xf0] }
  0x8c   :  { %1499 = vmatpush.bf16.msra.mxu2 %v2728_v1  ;;  %1486 = vmatmul.bf16.vlgmr.msra.gmra.mxu0 %v3811_v54  ;;  %v2540_v1 = vor.u32 %v3490_v56, %v2537_v57  ;;  %v3558_v56 = vld [vmem:[#allocation2 + $0x3ac] sm:$0xf] }
  0x8d   :  { %1541 = vmatpush.bf16.msrb.mxu0 %v3112_v14  ;;  %v3474_v57 = vld [vmem:[#allocation2 + $0x10c] sm:$0xf] }
  0x8e   :  { %1507 = vmatpush.bf16.msra.mxu1 %v2952_v6  ;;  %v2521_v6 = vld [vmem:[#allocation2 + $0x178] sm:$0xf0]  ;;  %v3578_v39 = vld [vmem:[#allocation2 + $0x44c] sm:$0xf] }
  0x8f   :  { %1521 = vmatpush.bf16.msra.mxu3 %v3080_v12  ;;  %1500 = vmatmul.bf16.vlgmr.msra.gmra.mxu2 %v3815_v60  ;;  %v2872_v12 = vor.u32 %v3576_v4, %v2871_v2  ;;  %v3590_v2 = vld [vmem:[#allocation2 + $0x4ac] sm:$0xf]  ;;  %v2812_v4 = vor.u32 %v3558_v56, %v2809_v59  ;;  %v2873_v56 = vld [vmem:[#allocation2 + $0x438] sm:$0xf0] }
  0x90   :  { %1548 = vmatpush.bf16.msrb.mxu2 %v2460_v5  ;;  %v3486_v5 = vld [vmem:[#allocation2 + $0x16c] sm:$0xf] }
  0x91   :  { %1562 = vmatpush.bf16.msra.mxu0 %v2588_v23  ;;  %v2524_v14 = vor.u32 %v3486_v5, %v2521_v6  ;;  %v2713_v23 = vld [vmem:[#allocation2 + $0x2f8] sm:$0xf0]  ;;  %v3522_v6 = vld [vmem:[#allocation2 + $0x28c] sm:$0xf] }
  0x92   :  { %1508 = vmatpush.bf16.msra.mxu1 %v2936_v20  ;;  %v2505_v20 = vld [vmem:[#allocation2 + $0x158] sm:$0xf0]  ;;  %v3510_v43 = vld [vmem:[#allocation2 + $0x22c] sm:$0xf] }
  0x93   :  { %1522 = vmatpush.bf16.msra.mxu3 %v3064_v25  ;;  %v3566_v25 = vld [vmem:[#allocation2 + $0x3ec] sm:$0xf] }
  0x94   :  { %1549 = vmatpush.bf16.msrb.mxu2 %v2444_v19  ;;  %v3482_v19 = vld [vmem:[#allocation2 + $0x14c] sm:$0xf]  ;;  %v2844_v36 = vor.u32 %v3566_v25, %v2841_v26 }
  0x95   :  { %1563 = vmatpush.bf16.msra.mxu0 %v2572_v35  ;;  %v2508_v30 = vor.u32 %v3482_v19, %v2505_v20  ;;  %v3530_v35 = vld [vmem:[#allocation2 + $0x2cc] sm:$0xf] }
  0x96   :  { %1509 = vmatpush.bf16.msra.mxu1 %v2920_v32  ;;  %v2716_v32 = vor.u32 %v3534_v22, %v2713_v23  ;;  %v3518_v19 = vld [vmem:[#allocation2 + $0x26c] sm:$0xf]  ;;  %v3065_v23 = vld [vmem:[#allocation2 + $0x5b8] sm:$0xf0] }
  0x97   :  { %1523 = vmatpush.bf16.msra.mxu3 %v3048_v38  ;;  %v2697_v38 = vld [vmem:[#allocation2 + $0x2d8] sm:$0xf0]  ;;  %v3550_v20 = vld [vmem:[#allocation2 + $0x36c] sm:$0xf] }
  0x98   :  { %1550 = vmatpush.bf16.msrb.mxu2 %v2428_v31  ;;  %v2984_v31 = vor.u32 %v3604_v21, %v2983_v18  ;;  %v2700_v47 = vor.u32 %v3530_v35, %v2697_v38  ;;  %v2777_v21 = vld [vmem:[#allocation2 + $0x378] sm:$0xf0]  ;;  %v3622_v22 = vld [vmem:[#allocation2 + $0x5ac] sm:$0xf] }
  0x99   :  { %1564 = vmatpush.bf16.msra.mxu0 %v2556_v49  ;;  %v2953_v49 = vld [vmem:[#allocation2 + $0x4d8] sm:$0xf0]  ;;  %v3582_v26 = vld [vmem:[#allocation2 + $0x46c] sm:$0xf]  ;;  %v2780_v28 = vor.u32 %v3550_v20, %v2777_v21  ;;  %v3068_v29 = vor.u32 %v3622_v22, %v3065_v23  ;;  %v3171_v23 = vld [vmem:[%s4344_s3 + $0x60] sm:$0xf] }
  0x9a   :  { %1510 = vmatpush.bf16.msra.mxu1 %v2904_v46  ;;  %v3594_v46 = vld [vmem:[#allocation2 + $0x4cc] sm:$0xf]  ;;  %v3049_v35 = vld [vmem:[#allocation2 + $0x598] sm:$0xf0] }
  0x9b   :  { %1524 = vmatpush.bf16.msra.mxu3 %v3032_v52  ;;  %v2681_v52 = vld [vmem:[#allocation2 + $0x2b8] sm:$0xf0]  ;;  %v2956_v63 = vor.u32 %v3594_v46, %v2953_v49 }
  0x9c   :  { %1551 = vmatpush.bf16.msrb.mxu2 %v2412_v45  ;;  %3119 = vmatmul.msk.bf16.vlgmr.msrb.gmra.mxu0 %vm1250_vm0, %v3835_v50  ;;  %v2972_v45 = vor.u32 %v3598_v33, %v2969_v34  ;;  %v2684_v0 = vor.u32 %v3526_v51, %v2681_v52  ;;  %v2761_v33 = vld [vmem:[#allocation2 + $0x358] sm:$0xf0]  ;;  %v3618_v34 = vld [vmem:[#allocation2 + $0x58c] sm:$0xf]  ;;  %v3878_v51 = vld [vmem:[%s4343_s2] sm:$0xf]  ;;  %v2620_v52 = vor.u32 %v3510_v43, %v2617_v44 }
  0x9d   :  { %1565 = vmatpush.bf16.msra.mxu0 %v2540_v1  ;;  %v2476_v1 = vor.u32 %v3474_v57, %v2473_v58  ;;  %v2745_v46 = vld [vmem:[#allocation2 + $0x338] sm:$0xf0]  ;;  %v3506_v57 = vld [vmem:[#allocation2 + $0x20c] sm:$0xf] }
  0x9e   :  { %1511 = vmatpush.bf16.msra.mxu1 %v2888_v62  ;;  %v3097_v62 = vld [vmem:[#allocation2 + $0x5f8] sm:$0xf0] }
  0x9f   :  { %1525 = vmatpush.bf16.msra.mxu3 %v3016_v3  ;;  %v2937_v3 = vld [vmem:[#allocation2 + $0x4b8] sm:$0xf0] }
  0xa0   :  { %1552 = vmatpush.bf16.msrb.mxu2 %v2396_v61  ;;  %v3630_v61 = vld [vmem:[#allocation2 + $0x5ec] sm:$0xf]  ;;  %v2940_v13 = vor.u32 %v3590_v2, %v2937_v3  ;;  %v3179_v2 = vld [vmem:[%s4344_s3 + $0x70] sm:$0xf]  ;;  %v3001_v20 = vld [vmem:[#allocation2 + $0x538] sm:$0xf0] }
  0xa1   :  { %1566 = vmatpush.bf16.msra.mxu0 %v2524_v14  ;;  %v3100_v5 = vor.u32 %v3630_v61, %v3097_v62  ;;  %v2668_v14 = vor.u32 %v3522_v6, %v2665_v7  ;;  %v2601_v62 = vld [vmem:[#allocation2 + $0x218] sm:$0xf0]  ;;  %v3610_v3 = vld [vmem:[#allocation2 + $0x54c] sm:$0xf]  ;;  %v3652_v7 = vld [vmem:[%s4344_s3 + $0x74] sm:$0xf0] }
  0xa2   :  { %1512 = vmatpush.bf16.msra.mxu1 %v2872_v12  ;;  %v3081_v12 = vld [vmem:[#allocation2 + $0x5d8] sm:$0xf0] }
  0xa3   :  { %1526 = vmatpush.bf16.msra.mxu3 %v3000_v17  ;;  %v3084_v18 = vor.u32 %v3626_v11, %v3081_v12  ;;  %v2604_v11 = vor.u32 %v3506_v57, %v2601_v62  ;;  %v3570_v12 = vld [vmem:[#allocation2 + $0x40c] sm:$0xf]  ;;  %v3147_v57 = vld [vmem:[%s4344_s3 + $0x30] sm:$0xf] }
  0xa4   :  { %1553 = vmatpush.bf16.msrb.mxu2 %v2380_v10  ;;  %v2793_v10 = vld [vmem:[#allocation2 + $0x398] sm:$0xf0]  ;;  %v3211_v62 = vld [vmem:[%s4344_s3 + $0xb0] sm:$0xf] }
  0xa5   :  { %1567 = vmatpush.bf16.msra.mxu0 %v2508_v30  ;;  %v2796_v17 = vor.u32 %v3554_v9, %v2793_v10  ;;  %v3514_v30 = vld [vmem:[#allocation2 + $0x24c] sm:$0xf]  ;;  %v3243_v9 = vld [vmem:[%s4344_s3 + $0xf0] sm:$0xf]  ;;  %v3668_v10 = vld [vmem:[%s4344_s3 + $0xf4] sm:$0xf0] }
  0xa6   :  { %1513 = vmatpush.bf16.msra.mxu1 %v2856_v27  ;;  %v2905_v27 = vld [vmem:[#allocation2 + $0x478] sm:$0xf0]  ;;  %v3244_v21 = vor.u32 %v3668_v10, %v3243_v9  ;;  %v3203_v9 = vld [vmem:[%s4344_s3 + $0xa0] sm:$0xf]  ;;  %v3658_v10 = vld [vmem:[%s4344_s3 + $0xa4] sm:$0xf0] }
  0xa7   :  { %1527 = vmatpush.bf16.msra.mxu3 %v2984_v31  ;;  %v2633_v31 = vld [vmem:[#allocation2 + $0x258] sm:$0xf0] }
  0xa8   :  { %1554 = vmatpush.bf16.msrb.mxu2 %v2364_v24  ;;  %v2924_v24 = vor.u32 %v3586_v15, %v2921_v16  ;;  %v2636_v38 = vor.u32 %v3514_v30, %v2633_v31  ;;  %v1263_v58 = vpop.f32.mrf.mxu0  ;;  %v3602_v31 = vld [vmem:[#allocation2 + $0x50c] sm:$0xf] }
  0xa9   :  { %1514 = vmatmul.bf16.vlgmr.msra.gmra.mxu1 %v3851_v37  ;;  %1568 = vmatpush.bf16.msra.mxu0 %v2492_v48  ;;  %v3033_v48 = vld [vmem:[#allocation2 + $0x578] sm:$0xf0] }
  0xaa   :  { %1576 = vmatpush.bf16.msrb.mxu1 %v2716_v32  ;;  %1528 = vmatmul.bf16.vlgmr.msra.gmra.mxu3 %v3853_v42  ;;  %v3546_v32 = vld [vmem:[#allocation2 + $0x34c] sm:$0xf] }
  0xab   :  { %1590 = vmatpush.bf16.msrb.mxu3 %v2844_v36  ;;  %v2908_v36 = vor.u32 %v3582_v26, %v2905_v27  ;;  %v2764_v40 = vor.u32 %v3546_v32, %v2761_v33  ;;  %v3235_v26 = vld [vmem:[%s4344_s3 + $0xe0] sm:$0xf]  ;;  %v3666_v27 = vld [vmem:[%s4344_s3 + $0xe4] sm:$0xf0]  ;;  %v2985_v32 = vld [vmem:[#allocation2 + $0x518] sm:$0xf0] }
  0xac   :  { %1555 = vmatpush.bf16.msrb.mxu2 %v2348_v41  ;;  %v3052_v41 = vor.u32 %v3618_v34, %v3049_v35  ;;  %v3163_v34 = vld [vmem:[%s4344_s3 + $0x50] sm:$0xf]  ;;  %v3648_v35 = vld [vmem:[%s4344_s3 + $0x54] sm:$0xf0]  ;;  %v2988_v43 = vor.u32 %v3602_v31, %v2985_v32  ;;  %v3654_v31 = vld [vmem:[%s4344_s3 + $0x84] sm:$0xf0] }
  0xad   :  { %1569 = vmatpush.bf16.msra.mxu0 %v2476_v1  ;;  %v1277_v1 = vpop.f32.mrf.mxu1  ;;  %v3667_v32 = vld [vmem:[%s4344_s3 + $0xf4] sm:$0xf] }
  0xae   :  { %1577 = vmatpush.bf16.msrb.mxu1 %v2700_v47  ;;  %v3614_v47 = vld [vmem:[#allocation2 + $0x56c] sm:$0xf] }
  0xaf   :  { %1591 = vmatpush.bf16.msrb.mxu3 %v2828_v53  ;;  %1556 = vmatmul.bf16.vlgmr.msrb.gmra.mxu2 %v3813_v55  ;;  %v2649_v55 = vld [vmem:[#allocation2 + $0x278] sm:$0xf0]  ;;  %v3574_v53 = vld [vmem:[#allocation2 + $0x42c] sm:$0xf]  ;;  %v3036_v61 = vor.u32 %v3614_v47, %v3033_v48  ;;  %v3219_v48 = vld [vmem:[%s4344_s3 + $0xc0] sm:$0xf] }
  0xb0   :  { %1604 = vmatpush.bf16.msra.mxu2 %v2972_v45  ;;  %1570 = vmatmul.bf16.vlgmr.msra.gmra.mxu0 %v3825_v8  ;;  %v2652_v25 = vor.u32 %v3518_v19, %v2649_v55  ;;  %v2889_v8 = vld [vmem:[#allocation2 + $0x458] sm:$0xf0]  ;;  %v3542_v45 = vld [vmem:[#allocation2 + $0x32c] sm:$0xf]  ;;  %v2876_v6 = vor.u32 %v3574_v53, %v2873_v56  ;;  %v3180_v19 = vor.u32 %v3652_v7, %v3179_v2  ;;  %v1265_v33 = vpop.f32.mrf.mxu0 }
  0xb1   :  { %1618 = vmatpush.bf16.msrb.mxu0 %v3100_v5  ;;  %v2892_v49 = vor.u32 %v3578_v39, %v2889_v8  ;;  %v2748_v59 = vor.u32 %v3542_v45, %v2745_v46  ;;  %v3883_v5 = vpop.f32.mrf.mxu2  ;;  %v3606_v55 = vld [vmem:[#allocation2 + $0x52c] sm:$0xf]  ;;  %v3227_v39 = vld [vmem:[%s4344_s3 + $0xd0] sm:$0xf]  ;;  %v3164_v45 = vor.u32 %v3648_v35, %v3163_v34  ;;  %v3646_v46 = vld [vmem:[%s4344_s3 + $0x44] sm:$0xf0] }
  0xb2   :  { %1578 = vmatpush.bf16.msrb.mxu1 %v2684_v0  ;;  %v2729_v0 = vld [vmem:[#allocation2 + $0x318] sm:$0xf0] }
  0xb3   :  { %1592 = vmatpush.bf16.msrb.mxu3 %v2812_v4  ;;  %v3017_v4 = vld [vmem:[#allocation2 + $0x558] sm:$0xf0] }
  0xb4   :  { %1605 = vmatpush.bf16.msra.mxu2 %v2956_v63  ;;  %v3538_v63 = vld [vmem:[#allocation2 + $0x30c] sm:$0xf]  ;;  %v3020_v16 = vor.u32 %v3610_v3, %v3017_v4 }
  0xb5   :  { %1619 = vmatpush.bf16.msrb.mxu0 %v3084_v18  ;;  %v2732_v15 = vor.u32 %v3538_v63, %v2729_v0  ;;  %v3113_v18 = vld [vmem:[#allocation2 + $0x618] sm:$0xf0]  ;;  %v3660_v63 = vld [vmem:[%s4344_s3 + $0xb4] sm:$0xf0] }
  0xb6   :  { %1579 = vmatpush.bf16.msrb.mxu1 %v2668_v14  ;;  %v262_v14 = vperm.slane %v3878_v51, 0  ;;  %v3212_v7 = vor.u32 %v3660_v63, %v3211_v62  ;;  %v3221_v62 = vld [vmem:[%s4344_s3 + $0xc8] sm:$0xf0] }
  0xb7   :  { %1593 = vmatpush.bf16.msrb.mxu3 %v2796_v17  ;;  %v3634_v17 = vld [vmem:[#allocation2 + $0x60c] sm:$0xf] }
  0xb8   :  { %1606 = vmatpush.bf16.msra.mxu2 %v2940_v13  ;;  %v2857_v13 = vld [vmem:[#allocation2 + $0x418] sm:$0xf0]  ;;  %v1266_v44 = vadd.f32 %v1265_v33, %v262_v14 }
  0xb9   :  { %1620 = vmatpush.bf16.msrb.mxu0 %v3068_v29  ;;  %v2860_v22 = vor.u32 %v3570_v12, %v2857_v13  ;;  %v3004_v29 = vor.u32 %v3606_v55, %v3001_v20  ;;  %v3195_v55 = vld [vmem:[%s4344_s3 + $0x90] sm:$0xf]  ;;  %v3656_v20 = vld [vmem:[%s4344_s3 + $0x94] sm:$0xf0]  ;;  %v3245_v33 = vld [vmem:[%s4344_s3 + $0xf8] sm:$0xf0] }
  0xba   :  { %1580 = vmatpush.bf16.msrb.mxu1 %v2652_v25  ;;  %v3116_v25 = vor.u32 %v3634_v17, %v3113_v18  ;;  %v3204_v17 = vor.u32 %v3658_v10, %v3203_v9  ;;  %v3213_v9 = vld [vmem:[%s4344_s3 + $0xb8] sm:$0xf0]  ;;  %v3684_v10 = vld [vmem:[%s4344_s3 + $0x174] sm:$0xf0] }
  0xbb   :  { %1594 = vmatpush.bf16.msrb.mxu3 %v2780_v28  ;;  %v1264_v28 = vadd.f32 %v1263_v58, %v262_v14  ;;  %v3644_v58 = vld [vmem:[%s4344_s3 + $0x34] sm:$0xf0] }
  0xbc   :  { %1607 = vmatpush.bf16.msra.mxu2 %v2924_v24  ;;  %v3650_v24 = vld [vmem:[%s4344_s3 + $0x64] sm:$0xf0]  ;;  %v3148_v3 = vor.u32 %v3644_v58, %v3147_v57  ;;  %v3645_v57 = vld [vmem:[%s4344_s3 + $0x44] sm:$0xf]  ;;  %v3157_v58 = vld [vmem:[%s4344_s3 + $0x48] sm:$0xf0] }
  0xbd   :  { %1621 = vmatpush.bf16.msrb.mxu0 %v3052_v41  ;;  %v3172_v30 = vor.u32 %v3650_v24, %v3171_v23  ;;  %v1278_v8 = vadd.f32 %v1277_v1, %v1264_v28  ;;  %v1293_v41 = vpop.f32.mrf.mxu2  ;;  %v3196_v28 = vor.u32 %v3656_v20, %v3195_v55  ;;  %v3205_v55 = vld [vmem:[%s4344_s3 + $0xa8] sm:$0xf0]  ;;  %v3299_v20 = vld [vmem:[%s4344_s3 + $0x160] sm:$0xf] }
  0xbe   :  { %1581 = vmatpush.bf16.msrb.mxu1 %v2636_v38  ;;  %v1279_v38 = vpop.f32.mrf.mxu1 }
  0xbf   :  { %1595 = vmatpush.bf16.msrb.mxu3 %v2764_v40  ;;  %v1305_v40 = vpop.f32.mrf.mxu3 }
  0xc0   :  { %1608 = vmatpush.bf16.msra.mxu2 %v2908_v36  ;;  %v3236_v36 = vor.u32 %v3666_v27, %v3235_v26  ;;  %v3638_v26 = vld [vmem:[%s4344_s3 + $0x4] sm:$0xf0]  ;;  %v3651_v27 = vld [vmem:[%s4344_s3 + $0x74] sm:$0xf] }
  0xc1   :  { %1622 = vmatpush.bf16.msrb.mxu0 %v3036_v61 }
  0xc2   :  { %1582 = vmatpush.bf16.msrb.mxu1 %v2620_v52  ;;  %v1280_v52 = vadd.f32 %v1279_v38, %v1266_v44  ;;  %v3665_v44 = vld [vmem:[%s4344_s3 + $0xe4] sm:$0xf] }
  0xc3   :  { %1596 = vmatpush.bf16.msrb.mxu3 %v2748_v59 }
  0xc4   :  { %1609 = vmatpush.bf16.msra.mxu2 %v2892_v49  ;;  %v3662_v49 = vld [vmem:[%s4344_s3 + $0xc4] sm:$0xf0]  ;;  %v1294_v2 = vadd.f32 %v1293_v41, %v1280_v52  ;;  %v3248_v41 = vor.u32 %v3667_v32, %v3245_v33  ;;  %v3229_v52 = vld [vmem:[%s4344_s3 + $0xd8] sm:$0xf0]  ;;  %v3291_v32 = vld [vmem:[%s4344_s3 + $0x150] sm:$0xf] }
  0xc5   :  { %1623 = vmatpush.bf16.msrb.mxu0 %v3020_v16  ;;  %v1319_v56 = vpop.f32.mrf.mxu0  ;;  %v3220_v59 = vor.u32 %v3662_v49, %v3219_v48  ;;  %v1347_v1 = vpop.f32.mrf.mxu2  ;;  %v3640_v16 = vld [vmem:[%s4344_s3 + $0x14] sm:$0xf0]  ;;  %v3165_v48 = vld [vmem:[%s4344_s3 + $0x58] sm:$0xf0] }
  0xc6   :  { %1583 = vmatpush.bf16.msrb.mxu1 %v2604_v11  ;;  %v1333_v61 = vpop.f32.mrf.mxu1 }
  0xc7   :  { %1597 = vmatpush.bf16.msrb.mxu3 %v2732_v15  ;;  %v1307_v4 = vpop.f32.mrf.mxu3  ;;  %v3131_v15 = vld [vmem:[%s4344_s3 + $0x10] sm:$0xf] }
  0xc8   :  { %1610 = vmatpush.bf16.msra.mxu2 %v2876_v6  ;;  %v3139_v6 = vld [vmem:[%s4344_s3 + $0x20] sm:$0xf]  ;;  %v1308_v11 = vadd.f32 %v1307_v4, %v1294_v2  ;;  %v3643_v2 = vld [vmem:[%s4344_s3 + $0x34] sm:$0xf] }
  0xc9   :  { %1584 = vmatmul.bf16.vlgmr.msrb.gmra.mxu1 %v3811_v54  ;;  %v3664_v54 = vld [vmem:[%s4344_s3 + $0xd4] sm:$0xf0]  ;;  %1624 = vmatpush.bf16.msrb.mxu0 %v3004_v29 }
  0xca   :  { %2062 = vmatpush.bf16.msra.mxu1 %v3244_v21  ;;  %1598 = vmatmul.bf16.vlgmr.msrb.gmra.mxu3 %v3815_v60  ;;  %v3155_v60 = vld [vmem:[%s4344_s3 + $0x40] sm:$0xf]  ;;  %v3228_v47 = vor.u32 %v3664_v54, %v3227_v39 }
  0xcb   :  { %2048 = vmatpush.bf16.msra.mxu3 %v3180_v19  ;;  %v3156_v53 = vor.u32 %v3646_v46, %v3155_v60 }
  0xcc   :  { %1611 = vmatpush.bf16.msra.mxu2 %v2860_v22  ;;  %v3132_v22 = vor.u32 %v3640_v16, %v3131_v15  ;;  %v3641_v16 = vld [vmem:[%s4344_s3 + $0x24] sm:$0xf] }
  0xcd   :  { %1625 = vmatpush.bf16.msrb.mxu0 %v2988_v43  ;;  %v1321_v14 = vpop.f32.mrf.mxu0  ;;  %v1349_v24 = vpop.f32.mrf.mxu2 }
  0xce   :  { %2063 = vmatpush.bf16.msra.mxu1 %v3236_v36  ;;  %v1322_v18 = vadd.f32 %v1321_v14, %v1308_v11  ;;  %v1335_v19 = vpop.f32.mrf.mxu1 }
  0xcf   :  { %2049 = vmatpush.bf16.msra.mxu3 %v3172_v30  ;;  %1612 = vmatmul.bf16.vlgmr.msra.gmra.mxu2 %v3851_v37  ;;  %v1292_v37 = vadd.f32 %v3883_v5, %v1278_v8  ;;  %v3187_v30 = vld [vmem:[%s4344_s3 + $0x80] sm:$0xf]  ;;  %v1361_v54 = vpop.f32.mrf.mxu3  ;;  %v3649_v8 = vld [vmem:[%s4344_s3 + $0x64] sm:$0xf] }
  0xd0   :  { %1639 = vmatpush.bf16.msrb.mxu2 %v3116_v25  ;;  %1626 = vmatmul.bf16.vlgmr.msrb.gmra.mxu0 %v3853_v42  ;;  %v3642_v42 = vld [vmem:[%s4344_s3 + $0x24] sm:$0xf0]  ;;  %v1336_v21 = vadd.f32 %v1335_v19, %v1322_v18  ;;  %v3123_v25 = vld [vmem:[%s4344_s3] sm:$0xf]  ;;  %v3188_v39 = vor.u32 %v3654_v31, %v3187_v30  ;;  %v3657_v19 = vld [vmem:[%s4344_s3 + $0xa4] sm:$0xf] }
  0xd1   :  { %v1306_v0 = vadd.f32 %v1305_v40, %v1292_v37  ;;  %v3140_v12 = vor.u32 %v3642_v42, %v3139_v6  ;;  %v3124_v35 = vor.u32 %v3638_v26, %v3123_v25  ;;  %v3173_v40 = vld [vmem:[%s4344_s3 + $0x68] sm:$0xf0]  ;;  %v3663_v37 = vld [vmem:[%s4344_s3 + $0xd4] sm:$0xf]  ;;  %v3197_v31 = vld [vmem:[%s4344_s3 + $0x98] sm:$0xf0] }
  0xd2   :  { %2064 = vmatpush.bf16.msra.mxu1 %v3228_v47  ;;  %v1350_v29 = vadd.f32 %v1349_v24, %v1336_v21  ;;  %v3176_v46 = vor.u32 %v3649_v8, %v3173_v40  ;;  %v3647_v47 = vld [vmem:[%s4344_s3 + $0x54] sm:$0xf] }
  0xd3   :  { %2050 = vmatpush.bf16.msra.mxu3 %v3164_v45  ;;  %v1320_v5 = vadd.f32 %v1319_v56, %v1306_v0  ;;  %v3237_v45 = vld [vmem:[%s4344_s3 + $0xe8] sm:$0xf0]  ;;  %v263_v56 = vperm.slane %v3878_v51, 1  ;;  %v3160_v0 = vor.u32 %v3645_v57, %v3157_v58  ;;  %v3639_v26 = vld [vmem:[%s4344_s3 + $0x14] sm:$0xf] }
  0xd4   :  { %v1650_v34 = vmax.f32 %v1350_v29, 0.0  ;;  %v3240_v49 = vor.u32 %v3665_v44, %v3237_v45  ;;  %v3655_v30 = vld [vmem:[%s4344_s3 + $0x94] sm:$0xf]  ;;  %v3653_v44 = vld [vmem:[%s4344_s3 + $0x84] sm:$0xf] }
  0xd5   :  { %v1334_v13 = vadd.f32 %v1333_v61, %v1320_v5  ;;  %v1375_v60 = vpop.f32.mrf.mxu2  ;;  %v3661_v61 = vld [vmem:[%s4344_s3 + $0xc4] sm:$0xf]  ;;  %v3307_v5 = vld [vmem:[%s4344_s3 + $0x170] sm:$0xf]  ;;  %v3200_v8 = vor.u32 %v3655_v30, %v3197_v31  ;;  %v3189_v45 = vld [vmem:[%s4344_s3 + $0x88] sm:$0xf0] }
  0xd6   :  { %2065 = vmatpush.bf16.msra.mxu1 %v3220_v59  ;;  %v3232_v59 = vor.u32 %v3663_v37, %v3229_v52  ;;  %v3224_v4 = vor.u32 %v3661_v61, %v3221_v62  ;;  %v3308_v11 = vor.u32 %v3684_v10, %v3307_v5  ;;  %v3678_v37 = vld [vmem:[%s4344_s3 + $0x144] sm:$0xf0]  ;;  %v3275_v57 = vld [vmem:[%s4344_s3 + $0x130] sm:$0xf]  ;;  %v3676_v58 = vld [vmem:[%s4344_s3 + $0x134] sm:$0xf0] }
  0xd7   :  { %2051 = vmatpush.bf16.msra.mxu3 %v3156_v53  ;;  %v1348_v23 = vadd.f32 %v1347_v1, %v1334_v13  ;;  %v3168_v53 = vor.u32 %v3647_v47, %v3165_v48  ;;  %v1363_v63 = vpop.f32.mrf.mxu3  ;;  %v1362_v1 = vadd.f32 %v1361_v54, %v263_v56  ;;  %v3125_v54 = vld [vmem:[%s4344_s3 + $0x8] sm:$0xf0]  ;;  %v3192_v48 = vor.u32 %v3653_v44, %v3189_v45  ;;  %v3672_v10 = vld [vmem:[%s4344_s3 + $0x114] sm:$0xf0]  ;;  %v3371_v31 = vld [vmem:[%s4344_s3 + $0x1f0] sm:$0xf] }
  0xd8   :  { %v1364_v14 = vadd.f32 %v1363_v63, %v263_v56  ;;  %2076 = vmatpush.bf16.msra.mxu2 %v3308_v11  ;;  %v3267_v63 = vld [vmem:[%s4344_s3 + $0x120] sm:$0xf]  ;;  %v3671_v45 = vld [vmem:[%s4344_s3 + $0x114] sm:$0xf] }
  0xd9   :  { %v1646_v36 = vmax.f32 %v1348_v23, 0.0  ;;  %v1376_v13 = vadd.f32 %v1375_v60, %v1362_v1 }
  0xda   :  { %2066 = vmatpush.bf16.msra.mxu1 %v3212_v7  ;;  %v3659_v7 = vld [vmem:[%s4344_s3 + $0xb4] sm:$0xf] }
  0xdb   :  { %2052 = vmatpush.bf16.msra.mxu3 %v3148_v3  ;;  %v4004_v43 = vpack.c.bf16 %v1650_v34, %v1646_v36  ;;  %v3149_v3 = vld [vmem:[%s4344_s3 + $0x38] sm:$0xf0]  ;;  %v3216_v18 = vor.u32 %v3659_v7, %v3213_v9  ;;  %v3259_v9 = vld [vmem:[%s4344_s3 + $0x110] sm:$0xf] }
  0xdc   :  { %v3260_v11 = vor.u32 %v3672_v10, %v3259_v9 }
  0xdd   :  { %v1377_v42 = vpop.f32.mrf.mxu2 }
  0xde   :  { %2067 = vmatpush.bf16.msra.mxu1 %v3204_v17  ;;  %v3141_v17 = vld [vmem:[%s4344_s3 + $0x28] sm:$0xf0]  ;;  %v1378_v24 = vadd.f32 %v1377_v42, %v1364_v14 }
  0xdf   :  { %2053 = vmatpush.bf16.msra.mxu3 %v3140_v12  ;;  %3120 = vmatmul.msk.bf16.vlgmr.msrb.gmra.mxu2 %vm1250_vm0, %v3835_v50  ;;  %v3181_v50 = vld [vmem:[%s4344_s3 + $0x78] sm:$0xf0]  ;;  %v3152_v12 = vor.u32 %v3643_v2, %v3149_v3  ;;  %v3144_v21 = vor.u32 %v3641_v16, %v3141_v17 }
  0xe0   :  { %v3184_v38 = vor.u32 %v3651_v27, %v3181_v50  ;;  %v3133_v27 = vld [vmem:[%s4344_s3 + $0x18] sm:$0xf0] }
  0xe1   :  { %v3136_v34 = vor.u32 %v3639_v26, %v3133_v27  ;;  %v3309_v16 = vld [vmem:[%s4344_s3 + $0x178] sm:$0xf0] }
  0xe2   :  { %2068 = vmatpush.bf16.msra.mxu1 %v3196_v28  ;;  %v3208_v28 = vor.u32 %v3657_v19, %v3205_v55  ;;  %v3301_v19 = vld [vmem:[%s4344_s3 + $0x168] sm:$0xf0] }
  0xe3   :  { %2054 = vmatpush.bf16.msra.mxu3 %v3132_v22  ;;  %v3682_v22 = vld [vmem:[%s4344_s3 + $0x164] sm:$0xf0] }
  0xe4   :  { %v3300_v29 = vor.u32 %v3682_v22, %v3299_v20  ;;  %v3679_v20 = vld [vmem:[%s4344_s3 + $0x154] sm:$0xf] }
  0xe5   :  { %v1389_v6 = vpop.f32.mrf.mxu0 }
  0xe6   :  { %2069 = vmatpush.bf16.msra.mxu1 %v3188_v39  ;;  %v1403_v15 = vpop.f32.mrf.mxu1  ;;  %v1390_v23 = vadd.f32 %v1389_v6, %v1376_v13  ;;  %2077 = vmatpush.bf16.msra.mxu2 %v3300_v29  ;;  %v3637_v39 = vld [vmem:[%s4344_s3 + $0x4] sm:$0xf]  ;;  %v3670_v13 = vld [vmem:[%s4344_s3 + $0x104] sm:$0xf0]  ;;  %v3675_v29 = vld [vmem:[%s4344_s3 + $0x134] sm:$0xf] }
  0xe7   :  { %2055 = vmatpush.bf16.msra.mxu3 %v3124_v35  ;;  %v3680_v35 = vld [vmem:[%s4344_s3 + $0x154] sm:$0xf0]  ;;  %v3128_v60 = vor.u32 %v3637_v39, %v3125_v54  ;;  %v3363_v54 = vld [vmem:[%s4344_s3 + $0x1e0] sm:$0xf] }
  0xe8   :  { %v1404_v36 = vadd.f32 %v1403_v15, %v1390_v23  ;;  %v3292_v40 = vor.u32 %v3680_v35, %v3291_v32  ;;  %v3683_v15 = vld [vmem:[%s4344_s3 + $0x174] sm:$0xf]  ;;  %v3700_v32 = vld [vmem:[%s4344_s3 + $0x1f4] sm:$0xf0]  ;;  %v3673_v35 = vld [vmem:[%s4344_s3 + $0x124] sm:$0xf] }
  0xe9   :  { %v3312_v17 = vor.u32 %v3683_v15, %v3309_v16 }
  0xea   :  { %2118 = vmatpush.bf16.msrb.mxu1 %v3248_v41  ;;  %2056 = vmatmul.bf16.vlgmr.msra.gmra.mxu3 %v4004_v43 }
  0xeb   :  { %2104 = vmatpush.bf16.msrb.mxu3 %v3184_v38  ;;  %2078 = vmatpush.bf16.msra.mxu2 %v3292_v40 }
  0xed   :  { %v1417_v25 = vpop.f32.mrf.mxu3  ;;  %v1391_v50 = vpop.f32.mrf.mxu0 }
  0xee   :  { %2119 = vmatpush.bf16.msrb.mxu1 %v3240_v49  ;;  %v1392_v38 = vadd.f32 %v1391_v50, %v1378_v24  ;;  %v1405_v41 = vpop.f32.mrf.mxu1  ;;  %v3283_v49 = vld [vmem:[%s4344_s3 + $0x140] sm:$0xf]  ;;  %v3677_v24 = vld [vmem:[%s4344_s3 + $0x144] sm:$0xf]  ;;  %v3277_v50 = vld [vmem:[%s4344_s3 + $0x138] sm:$0xf0] }
  0xef   :  { %2105 = vmatpush.bf16.msrb.mxu3 %v3176_v46  ;;  %v1418_v46 = vadd.f32 %v1417_v25, %v1404_v36  ;;  %v3284_v56 = vor.u32 %v3678_v37, %v3283_v49  ;;  %v3285_v25 = vld [vmem:[%s4344_s3 + $0x148] sm:$0xf0]  ;;  %v3280_v30 = vor.u32 %v3675_v29, %v3277_v50  ;;  %v3696_v37 = vld [vmem:[%s4344_s3 + $0x1d4] sm:$0xf0] }
  0xf0   :  { %v1406_v47 = vadd.f32 %v1405_v41, %v1392_v38  ;;  %v3288_v27 = vor.u32 %v3677_v24, %v3285_v25  ;;  %v3269_v36 = vld [vmem:[%s4344_s3 + $0x128] sm:$0xf0]  ;;  %v3315_v24 = vld [vmem:[%s4344_s3 + $0x180] sm:$0xf]  ;;  %v3686_v25 = vld [vmem:[%s4344_s3 + $0x184] sm:$0xf0] }
  0xf1   :  { %2079 = vmatpush.bf16.msra.mxu2 %v3284_v56  ;;  %v3272_v39 = vor.u32 %v3673_v35, %v3269_v36  ;;  %v3365_v35 = vld [vmem:[%s4344_s3 + $0x1e8] sm:$0xf0] }
  0xf2   :  { %2120 = vmatpush.bf16.msrb.mxu1 %v3232_v59  ;;  %v1431_v33 = vpop.f32.mrf.mxu2  ;;  %v3276_v59 = vor.u32 %v3676_v58, %v3275_v57  ;;  %v3669_v58 = vld [vmem:[%s4344_s3 + $0x104] sm:$0xf] }
  0xf3   :  { %2106 = vmatpush.bf16.msrb.mxu3 %v3168_v53  ;;  %v1432_v61 = vadd.f32 %v1431_v33, %v1418_v46  ;;  %v264_v33 = vperm.slane %v3878_v51, 2  ;;  %v3355_v46 = vld [vmem:[%s4344_s3 + $0x1d0] sm:$0xf] }
  0xf4   :  { %v3356_v56 = vor.u32 %v3696_v37, %v3355_v46  ;;  %v3341_v46 = vld [vmem:[%s4344_s3 + $0x1b8] sm:$0xf0]  ;;  %v265_v37 = vperm.slane %v3878_v51, 3 }
  0xf5   :  { %v1419_v52 = vpop.f32.mrf.mxu3  ;;  %v1445_v53 = vpop.f32.mrf.mxu0  ;;  %2080 = vmatpush.bf16.msra.mxu2 %v3276_v59  ;;  %v3253_v59 = vld [vmem:[%s4344_s3 + $0x108] sm:$0xf0]  ;;  %v3325_v51 = vld [vmem:[%s4344_s3 + $0x198] sm:$0xf0] }
  0xf6   :  { %2121 = vmatpush.bf16.msrb.mxu1 %v3224_v4  ;;  %v1420_v62 = vadd.f32 %v1419_v52, %v1406_v47  ;;  %v1446_v3 = vadd.f32 %v1445_v53, %v1432_v61  ;;  %v3256_v61 = vor.u32 %v3669_v58, %v3253_v59  ;;  %v3687_v59 = vld [vmem:[%s4344_s3 + $0x194] sm:$0xf] }
  0xf7   :  { %2107 = vmatpush.bf16.msrb.mxu3 %v3160_v0  ;;  %v3674_v0 = vld [vmem:[%s4344_s3 + $0x124] sm:$0xf0] }
  0xf8   :  { %v3268_v2 = vor.u32 %v3674_v0, %v3267_v63  ;;  %v1647_v42 = vmax.f32 %v1446_v3, 0.0  ;;  %v3694_v63 = vld [vmem:[%s4344_s3 + $0x1c4] sm:$0xf0] }
  0xfa   :  { %2122 = vmatpush.bf16.msrb.mxu1 %v3216_v18  ;;  %v1433_v1 = vpop.f32.mrf.mxu2  ;;  %2081 = vmatpush.bf16.msra.mxu2 %v3268_v2  ;;  %v3681_v18 = vld [vmem:[%s4344_s3 + $0x164] sm:$0xf] }
  0xfb   :  { %2108 = vmatpush.bf16.msrb.mxu3 %v3152_v12  ;;  %v1434_v4 = vadd.f32 %v1433_v1, %v1420_v62  ;;  %v3304_v55 = vor.u32 %v3681_v18, %v3301_v19  ;;  %v3347_v62 = vld [vmem:[%s4344_s3 + $0x1c0] sm:$0xf]  ;;  %v3323_v19 = vld [vmem:[%s4344_s3 + $0x190] sm:$0xf] }
  0xfc   :  { %v3348_v2 = vor.u32 %v3694_v63, %v3347_v62  ;;  %v3328_v62 = vor.u32 %v3687_v59, %v3325_v51  ;;  %v3685_v63 = vld [vmem:[%s4344_s3 + $0x184] sm:$0xf] }
  0xfd   :  { %v1447_v5 = vpop.f32.mrf.mxu0 }
  0xfe   :  { %2123 = vmatpush.bf16.msrb.mxu1 %v3208_v28  ;;  %v1448_v6 = vadd.f32 %v1447_v5, %v1434_v4  ;;  %2082 = vmatpush.bf16.msra.mxu2 %v3260_v11  ;;  %v3339_v5 = vld [vmem:[%s4344_s3 + $0x1b0] sm:$0xf] }
  0xff   :  { %2109 = vmatpush.bf16.msrb.mxu3 %v3144_v21  ;;  %v3293_v21 = vld [vmem:[%s4344_s3 + $0x158] sm:$0xf0] }
 0x100   :  { %v1651_v7 = vmax.f32 %v1448_v6, 0.0  ;;  %v3296_v23 = vor.u32 %v3679_v20, %v3293_v21  ;;  %v3692_v6 = vld [vmem:[%s4344_s3 + $0x1b4] sm:$0xf0] }
 0x101   :  { %v3340_v9 = vor.u32 %v3692_v6, %v3339_v5 }
 0x102   :  { %2124 = vmatpush.bf16.msrb.mxu1 %v3200_v8  ;;  %v1655_v12 = vpack.c.bf16 %v1651_v7, %v1647_v42  ;;  %v3698_v8 = vld [vmem:[%s4344_s3 + $0x1e4] sm:$0xf0] }
 0x103   :  { %2110 = vmatpush.bf16.msrb.mxu3 %v3136_v34  ;;  %v3372_v34 = vor.u32 %v3700_v32, %v3371_v31  ;;  %v3364_v41 = vor.u32 %v3698_v8, %v3363_v54  ;;  %v3373_v31 = vld [vmem:[%s4344_s3 + $0x1f8] sm:$0xf0] }
 0x104   :  { %2070 = vmatmul.bf16.vlgmr.msra.gmra.mxu1 %v1655_v12 }
 0x105   :  { %2090 = vmatpush.bf16.msra.mxu0 %v3372_v34  ;;  %v3697_v34 = vld [vmem:[%s4344_s3 + $0x1e4] sm:$0xf] }
 0x106   :  { %2125 = vmatpush.bf16.msrb.mxu1 %v3192_v48  ;;  %v1459_v22 = vpop.f32.mrf.mxu1  ;;  %v3368_v36 = vor.u32 %v3697_v34, %v3365_v35  ;;  %v3712_v34 = vld [vmem:[%s4346_s5 + $0x58] sm:$0xff]  ;;  %v3711_v35 = vld [vmem:[%s4346_s5 + $0x50] sm:$0xff] }
 0x107   :  { %2111 = vmatpush.bf16.msrb.mxu3 %v3128_v60  ;;  %v1460_v40 = vadd.f32 %v1459_v22, %v264_v33  ;;  %v3261_v60 = vld [vmem:[%s4344_s3 + $0x118] sm:$0xf0] }
 0x108   :  { %v3264_v49 = vor.u32 %v3671_v45, %v3261_v60  ;;  %v3691_v60 = vld [vmem:[%s4344_s3 + $0x1b4] sm:$0xf] }
 0x109   :  { %v1487_v26 = vpop.f32.mrf.mxu0  ;;  %2091 = vmatpush.bf16.msra.mxu0 %v3364_v41  ;;  %v3693_v41 = vld [vmem:[%s4344_s3 + $0x1c4] sm:$0xf] }
 0x10a   :  { %2112 = vmatmul.bf16.vlgmr.msrb.gmra.mxu3 %v4004_v43  ;;  %v3251_v43 = vld [vmem:[%s4344_s3 + $0x100] sm:$0xf] }
 0x10b   :  { %v3252_v14 = vor.u32 %v3670_v13, %v3251_v43  ;;  %v3331_v43 = vld [vmem:[%s4344_s3 + $0x1a0] sm:$0xf]  ;;  %v3690_v13 = vld [vmem:[%s4344_s3 + $0x1a4] sm:$0xf0] }
 0x10c   :  { %v3332_v16 = vor.u32 %v3690_v13, %v3331_v43 }
 0x10d   :  { %2083 = vmatpush.bf16.msra.mxu2 %v3252_v14  ;;  %v1473_v28 = vpop.f32.mrf.mxu3  ;;  %2092 = vmatpush.bf16.msra.mxu0 %v3356_v56  ;;  %v3689_v56 = vld [vmem:[%s4344_s3 + $0x1a4] sm:$0xf] }
 0x10e   :  { %v1461_v38 = vpop.f32.mrf.mxu1  ;;  %v1474_v52 = vadd.f32 %v1473_v28, %v1460_v40 }
 0x10f   :  { %v1462_v53 = vadd.f32 %v1461_v38, %v264_v33  ;;  %v3695_v38 = vld [vmem:[%s4344_s3 + $0x1d4] sm:$0xf] }
 0x110   :  { %v1488_v0 = vadd.f32 %v1487_v26, %v1474_v52 }
 0x111   :  { %2132 = vmatpush.bf16.msrb.mxu2 %v3312_v17  ;;  %v1489_v44 = vpop.f32.mrf.mxu0  ;;  %2093 = vmatpush.bf16.msra.mxu0 %v3348_v2 }
 0x112   :  { %v1501_v47 = vpop.f32.mrf.mxu2 }
 0x113   :  { %v1502_v42 = vadd.f32 %v1501_v47, %v1488_v0  ;;  %v3344_v47 = vor.u32 %v3691_v60, %v3341_v46  ;;  %v3317_v0 = vld [vmem:[%s4344_s3 + $0x188] sm:$0xf0] }
 0x114   :  { %2126 = vmatmul.bf16.vlgmr.msrb.gmra.mxu1 %v1655_v12 }
 0x115   :  { %2133 = vmatpush.bf16.msrb.mxu2 %v3304_v55  ;;  %v1475_v48 = vpop.f32.mrf.mxu3  ;;  %2094 = vmatpush.bf16.msra.mxu0 %v3340_v9  ;;  %v3688_v55 = vld [vmem:[%s4344_s3 + $0x194] sm:$0xf0] }
 0x116   :  { %v1476_v1 = vadd.f32 %v1475_v48, %v1462_v53  ;;  %v3324_v22 = vor.u32 %v3688_v55, %v3323_v19 }
 0x118   :  { %v1490_v7 = vadd.f32 %v1489_v44, %v1476_v1  ;;  %v3349_v44 = vld [vmem:[%s4344_s3 + $0x1c8] sm:$0xf0] }
 0x119   :  { %2134 = vmatpush.bf16.msrb.mxu2 %v3296_v23  ;;  %v1543_v3 = vpop.f32.mrf.mxu0  ;;  %2095 = vmatpush.bf16.msra.mxu0 %v3332_v16  ;;  %v3352_v45 = vor.u32 %v3693_v41, %v3349_v44 }
 0x11a   :  { %v1503_v10 = vpop.f32.mrf.mxu2 }
 0x11b   :  { %v1504_v14 = vadd.f32 %v1503_v10, %v1490_v7 }
 0x11d   :  { %2135 = vmatpush.bf16.msrb.mxu2 %v3288_v27  ;;  %2096 = vmatpush.bf16.msra.mxu0 %v3324_v22  ;;  %v3316_v27 = vor.u32 %v3686_v25, %v3315_v24  ;;  %v3707_v24 = vld [vmem:[%s4346_s5 + $0x30] sm:$0xff]  ;;  %v3706_v25 = vld [vmem:[%s4346_s5 + $0x28] sm:$0xff] }
 0x121   :  { %2136 = vmatpush.bf16.msrb.mxu2 %v3280_v30  ;;  %v1545_v23 = vpop.f32.mrf.mxu0  ;;  %v3699_v30 = vld [vmem:[%s4344_s3 + $0x1f4] sm:$0xf]  ;;  %2097 = vmatpush.bf16.msra.mxu0 %v3316_v27  ;;  %v3704_v27 = vld [vmem:[%s4346_s5 + $0x18] sm:$0xff] }
 0x122   :  { %v3376_v32 = vor.u32 %v3699_v30, %v3373_v31  ;;  %v3702_v30 = vld [vmem:[%s4346_s5 + $0x8] sm:$0xff] }
 0x123   :  { %v3714_v31 = vld [vmem:[%s4346_s5 + $0x68] sm:$0xff] }
 0x125   :  { %2137 = vmatpush.bf16.msrb.mxu2 %v3272_v39  ;;  %2146 = vmatpush.bf16.msrb.mxu0 %v3376_v32  ;;  %v3357_v39 = vld [vmem:[%s4344_s3 + $0x1d8] sm:$0xf0]  ;;  %v3701_v32 = vld [vmem:[%s4346_s5] sm:$0xff] }
 0x126   :  { %v1515_v57 = vpop.f32.mrf.mxu1  ;;  %v3360_v54 = vor.u32 %v3695_v38, %v3357_v39 }
 0x127   :  { %v1516_v11 = vadd.f32 %v1515_v57, %v1502_v42  ;;  %v3333_v57 = vld [vmem:[%s4344_s3 + $0x1a8] sm:$0xf0] }
 0x128   :  { %v3336_v58 = vor.u32 %v3689_v56, %v3333_v57 }
 0x129   :  { %2138 = vmatpush.bf16.msrb.mxu2 %v3264_v49  ;;  %2147 = vmatpush.bf16.msrb.mxu0 %v3368_v36 }
 0x12d   :  { %2139 = vmatpush.bf16.msrb.mxu2 %v3256_v61  ;;  %v1529_v4 = vpop.f32.mrf.mxu3  ;;  %v1571_v8 = vpop.f32.mrf.mxu0  ;;  %2148 = vmatpush.bf16.msrb.mxu0 %v3360_v54  ;;  %v3710_v54 = vld [vmem:[%s4346_s5 + $0x48] sm:$0xff] }
 0x12e   :  { %v1517_v12 = vpop.f32.mrf.mxu1  ;;  %v1530_v15 = vadd.f32 %v1529_v4, %v1516_v11  ;;  %v3320_v4 = vor.u32 %v3685_v63, %v3317_v0 }
 0x12f   :  { %v1518_v17 = vadd.f32 %v1517_v12, %v1504_v14 }
 0x130   :  { %v1544_v20 = vadd.f32 %v1543_v3, %v1530_v15 }
 0x131   :  { %2149 = vmatpush.bf16.msrb.mxu0 %v3352_v45 }
 0x132   :  { %v1648_v28 = vmax.f32 %v1544_v20, 0.0  ;;  %v1557_v50 = vpop.f32.mrf.mxu2 }
 0x133   :  { %v1558_v61 = vadd.f32 %v1557_v50, %v265_v37  ;;  %v3715_v50 = vld [vmem:[%s4346_s5 + $0x70] sm:$0xff] }
 0x135   :  { %v1531_v18 = vpop.f32.mrf.mxu3  ;;  %2150 = vmatpush.bf16.msrb.mxu0 %v3344_v47  ;;  %v1573_v52 = vpop.f32.mrf.mxu0  ;;  %v1572_v3 = vadd.f32 %v1571_v8, %v1558_v61  ;;  %v1722_v8 = vld [vmem:[%s4345_s4] sm:$0x3] }
 0x136   :  { %v1532_v21 = vadd.f32 %v1531_v18, %v1518_v17  ;;  %v1724_v41 = vperm.slane %v1722_v8, 0  ;;  %v1725_v0 = vperm.slane %v1722_v8, 1 }
 0x138   :  { %v1546_v26 = vadd.f32 %v1545_v23, %v1532_v21  ;;  %v3708_v23 = vld [vmem:[%s4346_s5 + $0x38] sm:$0xff] }
 0x139   :  { %2151 = vmatpush.bf16.msrb.mxu0 %v3336_v58  ;;  %2298 = vmatpush.bf16.msra.mxu3 %v3708_v23 }
 0x13a   :  { %v1652_v29 = vmax.f32 %v1546_v26, 0.0  ;;  %v1559_v40 = vpop.f32.mrf.mxu2  ;;  %v3705_v26 = vld [vmem:[%s4346_s5 + $0x20] sm:$0xff] }
 0x13b   :  { %v1560_v1 = vadd.f32 %v1559_v40, %v265_v37  ;;  %v3709_v40 = vld [vmem:[%s4346_s5 + $0x40] sm:$0xff] }
 0x13c   :  { %v1656_v33 = vpack.c.bf16 %v1652_v29, %v1648_v28  ;;  %v3716_v28 = vld [vmem:[%s4346_s5 + $0x78] sm:$0xff]  ;;  %v3703_v29 = vld [vmem:[%s4346_s5 + $0x10] sm:$0xff] }
 0x13d   :  { %2152 = vmatpush.bf16.msrb.mxu0 %v3328_v62  ;;  %v1574_v42 = vadd.f32 %v1573_v52, %v1560_v1  ;;  %2299 = vmatpush.bf16.msra.mxu3 %v3707_v24 }
 0x13e   :  { %2084 = vmatmul.bf16.vlgmr.msra.gmra.mxu2 %v1656_v33  ;;  %2312 = vmatpush.bf16.msra.mxu1 %v3716_v28 }
 0x141   :  { %2153 = vmatpush.bf16.msrb.mxu0 %v3320_v4  ;;  %2300 = vmatpush.bf16.msra.mxu3 %v3706_v25 }
 0x142   :  { %2313 = vmatpush.bf16.msra.mxu1 %v3715_v50 }
 0x145   :  { %2301 = vmatpush.bf16.msra.mxu3 %v3705_v26 }
 0x146   :  { %v1585_v48 = vpop.f32.mrf.mxu1  ;;  %2314 = vmatpush.bf16.msra.mxu1 %v3714_v31 }
 0x147   :  { %v1586_v7 = vadd.f32 %v1585_v48, %v1572_v3 }
 0x149   :  { %2302 = vmatpush.bf16.msra.mxu3 %v3704_v27 }
 0x14d   :  { %v1599_v53 = vpop.f32.mrf.mxu3  ;;  %v1627_v6 = vpop.f32.mrf.mxu0  ;;  %2303 = vmatpush.bf16.msra.mxu3 %v3703_v29 }
 0x14e   :  { %2140 = vmatmul.bf16.vlgmr.msrb.gmra.mxu2 %v1656_v33  ;;  %v1587_v5 = vpop.f32.mrf.mxu1  ;;  %v1600_v10 = vadd.f32 %v1599_v53, %v1586_v7  ;;  %v3713_v33 = vld [vmem:[%s4346_s5 + $0x60] sm:$0xff] }
 0x14f   :  { %v1588_v11 = vadd.f32 %v1587_v5, %v1574_v42  ;;  %2315 = vmatpush.bf16.msra.mxu1 %v3713_v33 }
 0x151   :  { %2304 = vmatpush.bf16.msra.mxu3 %v3702_v30 }
 0x152   :  { %v1613_v49 = vpop.f32.mrf.mxu2 }
 0x153   :  { %v1614_v13 = vadd.f32 %v1613_v49, %v1600_v10  ;;  %2316 = vmatpush.bf16.msra.mxu1 %v3712_v34 }
 0x155   :  { %v1601_v9 = vpop.f32.mrf.mxu3  ;;  %v1629_v15 = vpop.f32.mrf.mxu0  ;;  %v1628_v16 = vadd.f32 %v1627_v6, %v1614_v13  ;;  %2305 = vmatpush.bf16.msra.mxu3 %v3701_v32 }
 0x156   :  { %v1602_v12 = vadd.f32 %v1601_v9, %v1588_v11 }
 0x157   :  { %2317 = vmatpush.bf16.msra.mxu1 %v3711_v35 }
 0x15a   :  { %v1615_v2 = vpop.f32.mrf.mxu2 }
 0x15b   :  { %v1616_v14 = vadd.f32 %v1615_v2, %v1602_v12  ;;  %2318 = vmatpush.bf16.msra.mxu1 %v3710_v54 }
 0x15d   :  { %v1630_v17 = vadd.f32 %v1629_v15, %v1616_v14 }
 0x15f   :  { %2319 = vmatpush.bf16.msra.mxu1 %v3709_v40 }
 0x162   :  { %v1641_v43 = vpop.f32.mrf.mxu2 }
 0x163   :  { %v1642_v18 = vadd.f32 %v1641_v43, %v1628_v16 }
 0x165   :  { %v1649_v20 = vmax.f32 %v1642_v18, 0.0  ;;  %v3720_v18 = vld [vmem:[%s4347_s6] ss:$0 sm:$0xff] }
 0x16a   :  { %v1643_v19 = vpop.f32.mrf.mxu2 }
 0x16b   :  { %v1644_v55 = vadd.f32 %v1643_v19, %v1630_v17 }
 0x16d   :  { %v1653_v21 = vmax.f32 %v1644_v55, 0.0  ;;  %v2057_v36 = vpop.f32.mrf.mxu3 }
 0x16e   :  { %v2058_v47 = vadd.f32 %v2057_v36, %v1724_v41 }
 0x16f   :  { %v1657_v22 = vpack.c.bf16 %v1653_v21, %v1649_v20 }
 0x171   :  { %2098 = vmatmul.bf16.vlgmr.msra.gmra.mxu0 %v1657_v22 }
 0x175   :  { %v2059_v44 = vpop.f32.mrf.mxu3 }
 0x176   :  { %v2060_v48 = vadd.f32 %v2059_v44, %v1724_v41 }
 0x181   :  { %2154 = vmatmul.bf16.vlgmr.msrb.gmra.mxu0 %v1657_v22  ;;  %v2071_v38 = vpop.f32.mrf.mxu1 }
 0x182   :  { %v2072_v49 = vadd.f32 %v2071_v38, %v2058_v47 }
 0x189   :  { %v2073_v45 = vpop.f32.mrf.mxu1 }
 0x18a   :  { %v2074_v37 = vadd.f32 %v2073_v45, %v2060_v48 }
 0x18d   :  { %v2113_v53 = vpop.f32.mrf.mxu3 }
 0x18e   :  { %v2114_v4 = vadd.f32 %v2113_v53, %v1725_v0 }
 0x191   :  { %v2127_v58 = vpop.f32.mrf.mxu1 }
 0x192   :  { %v2128_v42 = vadd.f32 %v2127_v58, %v2114_v4 }
 0x195   :  { %v2115_v2 = vpop.f32.mrf.mxu3 }
 0x196   :  { %v2116_v6 = vadd.f32 %v2115_v2, %v1725_v0 }
 0x199   :  { %v2129_v5 = vpop.f32.mrf.mxu1 }
 0x19a   :  { %v2130_v9 = vadd.f32 %v2129_v5, %v2116_v6 }
 0x1c1   :  { %v2085_v39 = vpop.f32.mrf.mxu2 }
 0x1c2   :  { %v2086_v52 = vadd.f32 %v2085_v39, %v2072_v49 }
 0x1c9   :  { %v2087_v60 = vpop.f32.mrf.mxu2 }
 0x1ca   :  { %v2088_v56 = vadd.f32 %v2087_v60, %v2074_v37 }
 0x1d1   :  { %v2141_v61 = vpop.f32.mrf.mxu2 }
 0x1d2   :  { %v2142_v10 = vadd.f32 %v2141_v61, %v2128_v42 }
 0x1d9   :  { %v2143_v7 = vpop.f32.mrf.mxu2 }
 0x1da   :  { %v2144_v11 = vadd.f32 %v2143_v7, %v2130_v9 }
 0x1ee   :  { %v2099_v46 = vpop.f32.mrf.mxu0 }
 0x1ef   :  { %v2100_v57 = vadd.f32 %v2099_v46, %v2086_v52 }
 0x1f1   :  { %v2160_v62 = vmax.f32 %v2100_v57, 0.0 }
 0x1f6   :  { %v2101_v59 = vpop.f32.mrf.mxu0 }
 0x1f7   :  { %v2102_v51 = vadd.f32 %v2101_v59, %v2088_v56 }
 0x1f9   :  { %v2162_v63 = vmax.f32 %v2102_v51, 0.0 }
 0x1fb   :  { %v2164_v1 = vpack.c.bf16 %v2162_v63, %v2160_v62 }
 0x1fd   :  { %2306 = vmatmul.bf16.vlgmr.msra.gmra.mxu3 %v2164_v1 }
 0x1fe   :  { %v2155_v3 = vpop.f32.mrf.mxu0 }
 0x1ff   :  { %v2156_v12 = vadd.f32 %v2155_v3, %v2142_v10 }
 0x201   :  { %v2161_v14 = vmax.f32 %v2156_v12, 0.0 }
 0x206   :  { %v2157_v43 = vpop.f32.mrf.mxu0 }
 0x207   :  { %v2158_v13 = vadd.f32 %v2157_v43, %v2144_v11 }
 0x209   :  { %v2163_v15 = vmax.f32 %v2158_v13, 0.0 }
 0x20b   :  { %v2165_v16 = vpack.c.bf16 %v2163_v15, %v2161_v14 }
 0x20d   :  { %2320 = vmatmul.bf16.vlgmr.msra.gmra.mxu1 %v2165_v16 }
 0x280   :  { %v2307_v17 = vpop.f32.mrf.mxu3 }
 0x281   :  { %v2308_v19 = vadd.f32 %v3720_v18, %v2307_v17 }
 0x288   :  { %v2309_v21 = vpop.f32.mrf.mxu3 }
 0x289   :  { %v2310_v22 = vadd.f32 %v3720_v18, %v2309_v21 }
 0x28a   :  { %v2321_v55 = vpop.f32.mrf.mxu1 }
 0x28b   :  { %v2322_v20 = vadd.f32 %v2321_v55, %v2308_v19 }
 0x28d   :  { %2326 = vst [vmem:[%s4348_s7] sm:$0xff] %v2322_v20 }
 0x292   :  { %v2323_v23 = vpop.f32.mrf.mxu1 }
 0x293   :  { %v2324_v24 = vadd.f32 %v2323_v23, %v2310_v22 }
 0x295   :  { %2327 = vst [vmem:[%s4348_s7 + $0x8] sm:$0xff] %v2324_v24 }
 0x296   :  { %2332 = vsyncpa [#allocation3], 1 }

</bundles_post_ra>
